<compile_context>
chip_gen: v7x
topology: tpu7x:2x2x1
jax: 0.10.0
libtpu: 0.0.40
codegen_flags: <defaults>
</compile_context>

<pallas_src>
import jax
import jax.numpy as jnp
from jax.experimental import pallas as pl
from jax.experimental.pallas import tpu as pltpu

LANE = 128  # pad class-logit output to a full lane slab (unmasked stores)


# ----------------------------------------------------------------------------
# VMEM sizing helpers
# ----------------------------------------------------------------------------
def _vmem_budget_bytes():
    """3/4 of the chip's physical VMEM (headroom for Mosaic internal scratch)."""
    cap = 64 * 1024 * 1024  # conservative fallback (v7x physical per TC)
    try:
        info = pltpu.get_tpu_info()
        cap = int(getattr(info, "vmem_capacity_bytes", cap) or cap)
    except Exception:
        pass
    return (cap * 3) // 4


def _pick_tile_m(n, per_row_bytes, resident_bytes, budget):
    """Largest row tile (<=512, divides n) whose double-buffered working set fits."""
    for t in (512, 256, 128, 64, 32, 16, 8):
        if n % t == 0 and 2 * t * per_row_bytes + resident_bytes <= budget:
            return t
    # TODO(synk): graphs too large for the collapse-k layout need a k-tiled
    # accumulator grid (prior revision) or sparse block-skipping via
    # PrefetchScalarGridSpec with per-row nonzero block indices.
    raise ValueError("graph too large for collapse-k VMEM budget")


def _quantize_adjacency(a_hat):
    """Per-row int8 quantization of the (non-negative) normalized adjacency."""
    row_max = jnp.max(a_hat, axis=1, keepdims=True)
    scale = jnp.maximum(row_max, 1e-30) / 127.0
    q = jnp.round(a_hat / scale).astype(jnp.int8)
    return q, scale.astype(jnp.float32)


# ----------------------------------------------------------------------------
# Kernel 1: one GCN layer, 1-D grid over row tiles (k axis collapsed)
#   out[i] = ReLU( (scale[i] * (A_q[i, :] @ X)) @ W + b )
# ----------------------------------------------------------------------------
def gcn_layer_kernel(aq_ref, sc_ref, x_ref, w_ref, b_ref, o_ref):
    # int8 -> f32 -> bf16 dequant on the VPU; the per-row scale is folded in
    # after the matmul (A row sum is linear in the quantized values).
    a = aq_ref[...].astype(jnp.float32).astype(jnp.bfloat16)
    agg = jnp.dot(a, x_ref[...], preferred_element_type=jnp.float32) * sc_ref[...]
    h = jnp.dot(agg.astype(jnp.bfloat16), w_ref[...],
                preferred_element_type=jnp.float32) + b_ref[...]
    # NOTE: d_out (=32) < 128 lanes -> masked stores; small vs the A stream.
    o_ref[...] = jnp.maximum(h, 0.0).astype(o_ref.dtype)


def gcn_layer(a_q, a_scale, x_bf16, w_bf16, b_f32, *, vmem_budget):
    n = a_q.shape[0]
    d_in = x_bf16.shape[1]
    d_out = w_bf16.shape[1]
    assert n % 8 == 0, "pad the graph to a multiple of 8 nodes"  # TODO(synk): auto-pad
    resident = n * d_in * 2 + w_bf16.size * 2 + b_f32.size * 4
    per_row = n + 128 * 4 + d_out * 2          # int8 A row + padded scale + out row
    tile_m = _pick_tile_m(n, per_row, resident, vmem_budget)
    return pl.pallas_call(
        gcn_layer_kernel,
        out_shape=jax.ShapeDtypeStruct((n, d_out), jnp.bfloat16),
        grid=(n // tile_m,),
        in_specs=[
            pl.BlockSpec((tile_m, n), lambda i: (i, 0)),    # A_q row slab (int8)
            pl.BlockSpec((tile_m, 1), lambda i: (i, 0)),    # per-row dequant scale
            pl.BlockSpec((n, d_in), lambda i: (0, 0)),      # X: VMEM-resident (DMA once)
            pl.BlockSpec(w_bf16.shape, lambda i: (0, 0)),   # W (bf16, resident)
            pl.BlockSpec(b_f32.shape, lambda i: (0, 0)),    # b (f32, resident)
        ],
        out_specs=pl.BlockSpec((tile_m, d_out), lambda i: (i, 0)),
        compiler_params=pltpu.CompilerParams(
            # row axis 'parallel' -> sharded across v7x's 2 TensorCores
            dimension_semantics=("parallel",),
            vmem_limit_bytes=vmem_budget,
        ),
    )(a_q, a_scale, x_bf16, w_bf16, b_f32)


# ----------------------------------------------------------------------------
# Kernel 2: last GNN layer + 'concat' readout + fused multi-head classifier.
#   agg    = scale[i] * (A_q[i, :] @ H_prev)
#   h_last = ReLU(agg @ Wg + bg)
#   emb    = [prev_emb_row_tile, h_last]           (implicit, via W1 row split)
#   z      = ReLU(prev @ W1_top + h_last @ W1_bot + b1)        # (TM, C*H)
#   logits = z @ W2_blockdiag_padded + b2_padded               # (TM, 128)
# ----------------------------------------------------------------------------
def final_layer_head_kernel(aq_ref, sc_ref, hk_ref, prev_ref, wg_ref, bg_ref,
                            w1t_ref, w1b_ref, b1_ref, w2_ref, b2_ref, o_ref):
    a = aq_ref[...].astype(jnp.float32).astype(jnp.bfloat16)
    agg = jnp.dot(a, hk_ref[...], preferred_element_type=jnp.float32) * sc_ref[...]
    h_last = jnp.maximum(
        jnp.dot(agg.astype(jnp.bfloat16), wg_ref[...],
                preferred_element_type=jnp.float32) + bg_ref[...], 0.0)
    # all nr_classes heads fused: lane-dense (TM, C*H) matmul; the 'concat'
    # readout is a row-split of W1 (no concatenate materialized)
    z = jnp.maximum(
        jnp.dot(prev_ref[...], w1t_ref[...], preferred_element_type=jnp.float32)
        + jnp.dot(h_last.astype(jnp.bfloat16), w1b_ref[...],
                  preferred_element_type=jnp.float32)
        + b1_ref[...], 0.0)
    # block-diagonal second Linear; output is a full 128-lane slab -> unmasked vst
    o_ref[...] = (jnp.dot(z.astype(jnp.bfloat16), w2_ref[...],
                          preferred_element_type=jnp.float32)
                  + b2_ref[...]).astype(o_ref.dtype)


def final_layer_and_head(a_q, a_scale, h_prev_bf16, prev_emb_bf16,
                         wg, bg, w1t, w1b, b1h, w2bd, b2pad, *, vmem_budget):
    n = a_q.shape[0]
    d_k = h_prev_bf16.shape[1]
    d_prev = prev_emb_bf16.shape[1]
    assert n % 8 == 0, "pad the graph to a multiple of 8 nodes"
    resident = (n * d_k * 2
                + wg.size * 2 + bg.size * 4
                + w1t.size * 2 + w1b.size * 2 + b1h.size * 4
                + w2bd.size * 2 + b2pad.size * 4)
    per_row = n + 128 * 4 + d_prev * 2 + LANE * 4
    tile_m = _pick_tile_m(n, per_row, resident, vmem_budget)
    return pl.pallas_call(
        final_layer_head_kernel,
        out_shape=jax.ShapeDtypeStruct((n, LANE), jnp.float32),
        grid=(n // tile_m,),
        in_specs=[
            pl.BlockSpec((tile_m, n), lambda i: (i, 0)),      # A_q row slab (int8)
            pl.BlockSpec((tile_m, 1), lambda i: (i, 0)),      # per-row dequant scale
            pl.BlockSpec((n, d_k), lambda i: (0, 0)),         # H_prev: VMEM-resident
            pl.BlockSpec((tile_m, d_prev), lambda i: (i, 0)), # earlier-layer rows
            pl.BlockSpec(wg.shape, lambda i: (0, 0)),         # last GNN W (bf16)
            pl.BlockSpec(bg.shape, lambda i: (0, 0)),         # last GNN b
            pl.BlockSpec(w1t.shape, lambda i: (0, 0)),        # fused head W1 (top rows)
            pl.BlockSpec(w1b.shape, lambda i: (0, 0)),        # fused head W1 (bottom rows)
            pl.BlockSpec(b1h.shape, lambda i: (0, 0)),        # fused head b1
            pl.BlockSpec(w2bd.shape, lambda i: (0, 0)),       # block-diag W2 (padded)
            pl.BlockSpec(b2pad.shape, lambda i: (0, 0)),      # padded b2
        ],
        out_specs=pl.BlockSpec((tile_m, LANE), lambda i: (i, 0)),
        compiler_params=pltpu.CompilerParams(
            dimension_semantics=("parallel",),
            vmem_limit_bytes=vmem_budget,
        ),
    )(a_q, a_scale, h_prev_bf16, prev_emb_bf16, wg, bg, w1t, w1b, b1h, w2bd, b2pad)


# ----------------------------------------------------------------------------
# Full forward (readout_op='concat', seperate_heads=True)
# ----------------------------------------------------------------------------
def node_classifier_forward(a_hat, in_features, gnn_params, head_params):
    assert len(gnn_params) >= 2, "fused final-layer kernel assumes >=2 GNN layers"
    budget = _vmem_budget_bytes()

    # 8-bit adjacency stream (per-row scale); activations/weights in bf16.
    a_q, a_scale = _quantize_adjacency(a_hat)
    h = in_features.astype(jnp.bfloat16)

    # all GNN layers except the last (outputs kept in bf16 for the next A@H)
    prev_outputs = []
    for w, b in gnn_params[:-1]:
        h = gcn_layer(a_q, a_scale, h, w.astype(jnp.bfloat16), b, vmem_budget=budget)
        prev_outputs.append(h)
    # TODO(synk): for num_layers > 2, pass each earlier layer output as its own
    # kernel operand with its own W1 row split instead of materializing concat.
    prev_emb = (prev_outputs[0] if len(prev_outputs) == 1
                else jnp.concatenate(prev_outputs, axis=1))

    # fuse all nr_classes separate heads into two lane-dense matmuls
    w_last, b_last = gnn_params[-1]
    w1, b1, w2, b2 = head_params                    # (C,L,H), (C,H), (C,H), (1,C)
    n_classes, latent_dim, hidden_dim = w1.shape
    d_prev = prev_emb.shape[1]

    w1_all = jnp.transpose(w1, (1, 0, 2)).reshape(latent_dim,
                                                  n_classes * hidden_dim)
    w1_top = w1_all[:d_prev].astype(jnp.bfloat16)   # rows for earlier layers
    w1_bot = w1_all[d_prev:].astype(jnp.bfloat16)   # rows for the last layer
    b1_flat = b1.reshape(1, n_classes * hidden_dim)

    eye = jnp.eye(n_classes, dtype=w2.dtype)
    w2_blockdiag = (w2[:, :, None] * eye[:, None, :]).reshape(
        n_classes * hidden_dim, n_classes)
    w2_blockdiag = jnp.pad(
        w2_blockdiag, ((0, 0), (0, LANE - n_classes))).astype(jnp.bfloat16)
    b2_padded = jnp.pad(b2, ((0, 0), (0, LANE - n_classes)))

    logits_pad = final_layer_and_head(
        a_q, a_scale, h, prev_emb,
        w_last.astype(jnp.bfloat16), b_last,
        w1_top, w1_bot, b1_flat, w2_blockdiag, b2_padded,
        vmem_budget=budget)
    return logits_pad[:, :n_classes]


# ----------------------------------------------------------------------------
# Pure-JAX f32 reference (PyTorch-semantics, full precision)
# ----------------------------------------------------------------------------
def reference_forward(a_hat, x, gnn_params, head_params):
    hi = jax.lax.Precision.HIGHEST
    h = x
    prev = []
    for w, b in gnn_params[:-1]:
        agg = jnp.dot(a_hat, h, precision=hi)
        h = jnp.maximum(jnp.dot(agg, w, precision=hi) + b, 0.0)
        prev.append(h)
    w_last, b_last = gnn_params[-1]
    agg = jnp.dot(a_hat, h, precision=hi)
    h_last = jnp.maximum(jnp.dot(agg, w_last, precision=hi) + b_last, 0.0)
    emb = jnp.concatenate(prev + [h_last], axis=1)
    w1, b1, w2, b2 = head_params
    cols = []
    for c in range(w1.shape[0]):
        z = jnp.maximum(jnp.dot(emb, w1[c], precision=hi) + b1[c][None, :], 0.0)
        cols.append(jnp.dot(z, w2[c][:, None], precision=hi))
    return jnp.concatenate(cols, axis=1) + b2


# ----------------------------------------------------------------------------
# Deterministic parameter / input construction
# ----------------------------------------------------------------------------
def build_params(key, in_dim, gnn_dim, num_layers, nr_classes):
    latent_dim = gnn_dim * num_layers          # readout_op == 'concat'
    hidden_dim = latent_dim                    # ClassifierHead default

    keys = jax.random.split(key, 2 * num_layers + 4)
    gnn_params = []
    d_prev = in_dim
    for layer in range(num_layers):
        w = jax.random.normal(keys[2 * layer], (d_prev, gnn_dim), jnp.float32) * 0.1
        b = jax.random.normal(keys[2 * layer + 1], (1, gnn_dim), jnp.float32) * 0.1
        gnn_params.append((w, b))
        d_prev = gnn_dim

    k_w1, k_b1, k_w2, k_b2 = keys[2 * num_layers:]
    w1 = jax.random.normal(k_w1, (nr_classes, latent_dim, hidden_dim), jnp.float32) * 0.1
    b1 = jax.random.normal(k_b1, (nr_classes, hidden_dim), jnp.float32) * 0.1
    w2 = jax.random.normal(k_w2, (nr_classes, hidden_dim), jnp.float32) * 0.1
    b2 = jax.random.normal(k_b2, (1, nr_classes), jnp.float32) * 0.1
    return gnn_params, (w1, b1, w2, b2)


def build_graph(key, n_nodes):
    """Random undirected graph -> dense symmetric-normalized adjacency."""
    adj_raw = (jax.random.uniform(key, (n_nodes, n_nodes)) < 0.2).astype(jnp.float32)
    adj = jnp.maximum(adj_raw, adj_raw.T)
    adj = adj + jnp.eye(n_nodes, dtype=jnp.float32)           # self loops
    deg = jnp.sum(adj, axis=1)
    d_inv_sqrt = 1.0 / jnp.sqrt(deg)
    return adj * d_inv_sqrt[:, None] * d_inv_sqrt[None, :]    # D^-1/2 A D^-1/2


if __name__ == "__main__":
    # Small shapes consistent with the module (big enough to exercise the grid)
    N_NODES = 256
    IN_DIM = 16          # graph.ndata[GNN_NODE_FEAT_IN] feature dim
    GNN_OUT_DIM = 32     # gnn_config['output_dim']
    NUM_LAYERS = 2       # gnn_config['num_layers'], readout_op='concat'
    NR_CLASSES = 4

    root = jax.random.PRNGKey(0)
    k_graph, k_feat, k_param = jax.random.split(root, 3)

    a_hat = build_graph(k_graph, N_NODES)
    in_features = jax.random.normal(k_feat, (N_NODES, IN_DIM), jnp.float32)
    gnn_params, head_params = build_params(
        k_param, IN_DIM, GNN_OUT_DIM, NUM_LAYERS, NR_CLASSES)

    forward = jax.jit(node_classifier_forward)
    node_logit = forward(a_hat, in_features, gnn_params, head_params)
    node_logit = jax.block_until_ready(node_logit)

    assert node_logit.shape == (N_NODES, NR_CLASSES)
    assert node_logit.dtype == jnp.float32

    # Validate against a full-precision f32 reference (int8 A + bf16 compute
    # introduce small, bounded quantization/rounding error).
    ref = jax.block_until_ready(
        reference_forward(a_hat, in_features, gnn_params, head_params))
    max_err = float(jnp.max(jnp.abs(node_logit - ref)))
    assert max_err < 3e-2, f"max abs error vs f32 reference: {max_err}"

    print("KERNEL_OK")
</pallas_src>

<mosaic_0001>
module attributes {stable_mosaic.version = 11 : i64} {
  func.func @final_layer_head_kernel(%arg0: i32, %arg1: memref<256x256xi8, #tpu.memory_space<vmem>>, %arg2: memref<256x1xf32, #tpu.memory_space<vmem>>, %arg3: memref<256x32xbf16, #tpu.memory_space<vmem>>, %arg4: memref<256x32xbf16, #tpu.memory_space<vmem>>, %arg5: memref<32x32xbf16, #tpu.memory_space<vmem>>, %arg6: memref<1x32xf32, #tpu.memory_space<vmem>>, %arg7: memref<32x256xbf16, #tpu.memory_space<vmem>>, %arg8: memref<32x256xbf16, #tpu.memory_space<vmem>>, %arg9: memref<1x256xf32, #tpu.memory_space<vmem>>, %arg10: memref<256x128xbf16, #tpu.memory_space<vmem>>, %arg11: memref<1x128xf32, #tpu.memory_space<vmem>>, %arg12: memref<256x128xf32, #tpu.memory_space<vmem>>) attributes {dimension_semantics = [#tpu.dimension_semantics<parallel>], iteration_bounds = array<i64: 1>, scalar_prefetch = 0 : i64, scratch_operands = 0 : i64, tpu.core_type = #tpu.core_type<tc>, window_params = [{transform_indices = @transform_0, window_bounds = array<i64: 256, 256>}, {transform_indices = @transform_1, window_bounds = array<i64: 256, 1>}, {pipeline_mode = #tpu.pipeline_mode<synchronous>, transform_indices = @transform_2, window_bounds = array<i64: 256, 32>}, {transform_indices = @transform_3, window_bounds = array<i64: 256, 32>}, {pipeline_mode = #tpu.pipeline_mode<synchronous>, transform_indices = @transform_4, window_bounds = array<i64: 32, 32>}, {pipeline_mode = #tpu.pipeline_mode<synchronous>, transform_indices = @transform_5, window_bounds = array<i64: 1, 32>}, {pipeline_mode = #tpu.pipeline_mode<synchronous>, transform_indices = @transform_6, window_bounds = array<i64: 32, 256>}, {pipeline_mode = #tpu.pipeline_mode<synchronous>, transform_indices = @transform_7, window_bounds = array<i64: 32, 256>}, {pipeline_mode = #tpu.pipeline_mode<synchronous>, transform_indices = @transform_8, window_bounds = array<i64: 1, 256>}, {pipeline_mode = #tpu.pipeline_mode<synchronous>, transform_indices = @transform_9, window_bounds = array<i64: 256, 128>}, {pipeline_mode = #tpu.pipeline_mode<synchronous>, transform_indices = @transform_10, window_bounds = array<i64: 1, 128>}, {transform_indices = @transform_11, window_bounds = array<i64: 256, 128>}]} {
    %c0 = arith.constant 0 : index
    %c0_0 = arith.constant 0 : index
    %0 = vector.load %arg1[%c0, %c0_0] : memref<256x256xi8, #tpu.memory_space<vmem>>, vector<256x256xi8>
    %1 = arith.sitofp %0 : vector<256x256xi8> to vector<256x256xf32>
    %2 = arith.truncf %1 : vector<256x256xf32> to vector<256x256xbf16>
    %c0_1 = arith.constant 0 : index
    %c0_2 = arith.constant 0 : index
    %3 = vector.load %arg3[%c0_1, %c0_2] : memref<256x32xbf16, #tpu.memory_space<vmem>>, vector<256x32xbf16>
    %cst = arith.constant dense<0.000000e+00> : vector<256x32xf32>
    %4 = tpu.matmul %2, %3, %cst {dimension_numbers = #tpu.dot_dimension_numbers<[1], [0], [0], [1], [0, 0, 1, 1], [], []>} : vector<256x256xbf16>, vector<256x32xbf16>, vector<256x32xf32> -> vector<256x32xf32>
    %c0_3 = arith.constant 0 : index
    %c0_4 = arith.constant 0 : index
    %5 = vector.load %arg2[%c0_3, %c0_4] : memref<256x1xf32, #tpu.memory_space<vmem>>, vector<256x1xf32>
    %6 = vector.broadcast %5 : vector<256x1xf32> to vector<256x32xf32>
    %7 = arith.mulf %4, %6 : vector<256x32xf32>
    %8 = arith.truncf %7 : vector<256x32xf32> to vector<256x32xbf16>
    %c0_5 = arith.constant 0 : index
    %c0_6 = arith.constant 0 : index
    %9 = vector.load %arg5[%c0_5, %c0_6] : memref<32x32xbf16, #tpu.memory_space<vmem>>, vector<32x32xbf16>
    %cst_7 = arith.constant dense<0.000000e+00> : vector<256x32xf32>
    %10 = tpu.matmul %8, %9, %cst_7 {dimension_numbers = #tpu.dot_dimension_numbers<[1], [0], [0], [1], [0, 0, 1, 1], [], []>} : vector<256x32xbf16>, vector<32x32xbf16>, vector<256x32xf32> -> vector<256x32xf32>
    %c0_8 = arith.constant 0 : index
    %c0_9 = arith.constant 0 : index
    %11 = vector.load %arg6[%c0_8, %c0_9] : memref<1x32xf32, #tpu.memory_space<vmem>>, vector<1x32xf32>
    %12 = vector.broadcast %11 : vector<1x32xf32> to vector<256x32xf32>
    %13 = arith.addf %10, %12 : vector<256x32xf32>
    %cst_10 = arith.constant 0.000000e+00 : f32
    %14 = vector.broadcast %cst_10 : f32 to vector<256x32xf32>
    %15 = arith.maximumf %13, %14 : vector<256x32xf32>
    %c0_11 = arith.constant 0 : index
    %c0_12 = arith.constant 0 : index
    %16 = vector.load %arg4[%c0_11, %c0_12] : memref<256x32xbf16, #tpu.memory_space<vmem>>, vector<256x32xbf16>
    %c0_13 = arith.constant 0 : index
    %c0_14 = arith.constant 0 : index
    %17 = vector.load %arg7[%c0_13, %c0_14] : memref<32x256xbf16, #tpu.memory_space<vmem>>, vector<32x256xbf16>
    %cst_15 = arith.constant dense<0.000000e+00> : vector<256x256xf32>
    %18 = tpu.matmul %16, %17, %cst_15 {dimension_numbers = #tpu.dot_dimension_numbers<[1], [0], [0], [1], [0, 0, 1, 1], [], []>} : vector<256x32xbf16>, vector<32x256xbf16>, vector<256x256xf32> -> vector<256x256xf32>
    %19 = arith.truncf %15 : vector<256x32xf32> to vector<256x32xbf16>
    %c0_16 = arith.constant 0 : index
    %c0_17 = arith.constant 0 : index
    %20 = vector.load %arg8[%c0_16, %c0_17] : memref<32x256xbf16, #tpu.memory_space<vmem>>, vector<32x256xbf16>
    %cst_18 = arith.constant dense<0.000000e+00> : vector<256x256xf32>
    %21 = tpu.matmul %19, %20, %cst_18 {dimension_numbers = #tpu.dot_dimension_numbers<[1], [0], [0], [1], [0, 0, 1, 1], [], []>} : vector<256x32xbf16>, vector<32x256xbf16>, vector<256x256xf32> -> vector<256x256xf32>
    %22 = arith.addf %18, %21 : vector<256x256xf32>
    %c0_19 = arith.constant 0 : index
    %c0_20 = arith.constant 0 : index
    %23 = vector.load %arg9[%c0_19, %c0_20] : memref<1x256xf32, #tpu.memory_space<vmem>>, vector<1x256xf32>
    %24 = vector.broadcast %23 : vector<1x256xf32> to vector<256x256xf32>
    %25 = arith.addf %22, %24 : vector<256x256xf32>
    %cst_21 = arith.constant 0.000000e+00 : f32
    %26 = vector.broadcast %cst_21 : f32 to vector<256x256xf32>
    %27 = arith.maximumf %25, %26 : vector<256x256xf32>
    %28 = arith.truncf %27 : vector<256x256xf32> to vector<256x256xbf16>
    %c0_22 = arith.constant 0 : index
    %c0_23 = arith.constant 0 : index
    %29 = vector.load %arg10[%c0_22, %c0_23] : memref<256x128xbf16, #tpu.memory_space<vmem>>, vector<256x128xbf16>
    %cst_24 = arith.constant dense<0.000000e+00> : vector<256x128xf32>
    %30 = tpu.matmul %28, %29, %cst_24 {dimension_numbers = #tpu.dot_dimension_numbers<[1], [0], [0], [1], [0, 0, 1, 1], [], []>} : vector<256x256xbf16>, vector<256x128xbf16>, vector<256x128xf32> -> vector<256x128xf32>
    %c0_25 = arith.constant 0 : index
    %c0_26 = arith.constant 0 : index
    %31 = vector.load %arg11[%c0_25, %c0_26] : memref<1x128xf32, #tpu.memory_space<vmem>>, vector<1x128xf32>
    %32 = vector.broadcast %31 : vector<1x128xf32> to vector<256x128xf32>
    %33 = arith.addf %30, %32 : vector<256x128xf32>
    %c0_27 = arith.constant 0 : index
    %c0_28 = arith.constant 0 : index
    %34 = vector.load %arg12[%c0_27, %c0_28] : memref<256x128xf32, #tpu.memory_space<vmem>>, vector<256x128xf32>
    tpu.vector_store %arg12[%c0_27, %c0_28], %33 {strides = array<i32>} : memref<256x128xf32, #tpu.memory_space<vmem>>, vector<256x128xf32>,
    return
  }
  func.func @transform_0(%arg0: i32) -> (i32, i32) {
    %c0_i32 = arith.constant 0 : i32
    %c0_i32_0 = arith.constant 0 : i32
    return %arg0, %c0_i32 : i32, i32
  }
  func.func @transform_1(%arg0: i32) -> (i32, i32) {
    %c0_i32 = arith.constant 0 : i32
    %c0_i32_0 = arith.constant 0 : i32
    return %arg0, %c0_i32 : i32, i32
  }
  func.func @transform_2(%arg0: i32) -> (i32, i32) {
    %c0_i32 = arith.constant 0 : i32
    %c0_i32_0 = arith.constant 0 : i32
    %c0_i32_1 = arith.constant 0 : i32
    return %c0_i32, %c0_i32_0 : i32, i32
  }
  func.func @transform_3(%arg0: i32) -> (i32, i32) {
    %c0_i32 = arith.constant 0 : i32
    %c0_i32_0 = arith.constant 0 : i32
    return %arg0, %c0_i32 : i32, i32
  }
  func.func @transform_4(%arg0: i32) -> (i32, i32) {
    %c0_i32 = arith.constant 0 : i32
    %c0_i32_0 = arith.constant 0 : i32
    %c0_i32_1 = arith.constant 0 : i32
    return %c0_i32, %c0_i32_0 : i32, i32
  }
  func.func @transform_5(%arg0: i32) -> (i32, i32) {
    %c0_i32 = arith.constant 0 : i32
    %c0_i32_0 = arith.constant 0 : i32
    %c0_i32_1 = arith.constant 0 : i32
    return %c0_i32, %c0_i32_0 : i32, i32
  }
  func.func @transform_6(%arg0: i32) -> (i32, i32) {
    %c0_i32 = arith.constant 0 : i32
    %c0_i32_0 = arith.constant 0 : i32
    %c0_i32_1 = arith.constant 0 : i32
    return %c0_i32, %c0_i32_0 : i32, i32
  }
  func.func @transform_7(%arg0: i32) -> (i32, i32) {
    %c0_i32 = arith.constant 0 : i32
    %c0_i32_0 = arith.constant 0 : i32
    %c0_i32_1 = arith.constant 0 : i32
    return %c0_i32, %c0_i32_0 : i32, i32
  }
  func.func @transform_8(%arg0: i32) -> (i32, i32) {
    %c0_i32 = arith.constant 0 : i32
    %c0_i32_0 = arith.constant 0 : i32
    %c0_i32_1 = arith.constant 0 : i32
    return %c0_i32, %c0_i32_0 : i32, i32
  }
  func.func @transform_9(%arg0: i32) -> (i32, i32) {
    %c0_i32 = arith.constant 0 : i32
    %c0_i32_0 = arith.constant 0 : i32
    %c0_i32_1 = arith.constant 0 : i32
    return %c0_i32, %c0_i32_0 : i32, i32
  }
  func.func @transform_10(%arg0: i32) -> (i32, i32) {
    %c0_i32 = arith.constant 0 : i32
    %c0_i32_0 = arith.constant 0 : i32
    %c0_i32_1 = arith.constant 0 : i32
    return %c0_i32, %c0_i32_0 : i32, i32
  }
  func.func @transform_11(%arg0: i32) -> (i32, i32) {
    %c0_i32 = arith.constant 0 : i32
    %c0_i32_0 = arith.constant 0 : i32
    return %arg0, %c0_i32 : i32, i32
  }
}

module attributes {stable_mosaic.version = 11 : i64} {
  func.func @gcn_layer_kernel(%arg0: i32, %arg1: memref<256x256xi8, #tpu.memory_space<vmem>>, %arg2: memref<256x1xf32, #tpu.memory_space<vmem>>, %arg3: memref<256x16xbf16, #tpu.memory_space<vmem>>, %arg4: memref<16x32xbf16, #tpu.memory_space<vmem>>, %arg5: memref<1x32xf32, #tpu.memory_space<vmem>>, %arg6: memref<256x32xbf16, #tpu.memory_space<vmem>>) attributes {dimension_semantics = [#tpu.dimension_semantics<parallel>], iteration_bounds = array<i64: 1>, scalar_prefetch = 0 : i64, scratch_operands = 0 : i64, tpu.core_type = #tpu.core_type<tc>, window_params = [{transform_indices = @transform_0, window_bounds = array<i64: 256, 256>}, {transform_indices = @transform_1, window_bounds = array<i64: 256, 1>}, {pipeline_mode = #tpu.pipeline_mode<synchronous>, transform_indices = @transform_2, window_bounds = array<i64: 256, 16>}, {pipeline_mode = #tpu.pipeline_mode<synchronous>, transform_indices = @transform_3, window_bounds = array<i64: 16, 32>}, {pipeline_mode = #tpu.pipeline_mode<synchronous>, transform_indices = @transform_4, window_bounds = array<i64: 1, 32>}, {transform_indices = @transform_5, window_bounds = array<i64: 256, 32>}]} {
    %c0 = arith.constant 0 : index
    %c0_0 = arith.constant 0 : index
    %0 = vector.load %arg1[%c0, %c0_0] : memref<256x256xi8, #tpu.memory_space<vmem>>, vector<256x256xi8>
    %1 = arith.sitofp %0 : vector<256x256xi8> to vector<256x256xf32>
    %2 = arith.truncf %1 : vector<256x256xf32> to vector<256x256xbf16>
    %c0_1 = arith.constant 0 : index
    %c0_2 = arith.constant 0 : index
    %3 = vector.load %arg3[%c0_1, %c0_2] : memref<256x16xbf16, #tpu.memory_space<vmem>>, vector<256x16xbf16>
    %cst = arith.constant dense<0.000000e+00> : vector<256x16xf32>
    %4 = tpu.matmul %2, %3, %cst {dimension_numbers = #tpu.dot_dimension_numbers<[1], [0], [0], [1], [0, 0, 1, 1], [], []>} : vector<256x256xbf16>, vector<256x16xbf16>, vector<256x16xf32> -> vector<256x16xf32>
    %c0_3 = arith.constant 0 : index
    %c0_4 = arith.constant 0 : index
    %5 = vector.load %arg2[%c0_3, %c0_4] : memref<256x1xf32, #tpu.memory_space<vmem>>, vector<256x1xf32>
    %6 = vector.broadcast %5 : vector<256x1xf32> to vector<256x16xf32>
    %7 = arith.mulf %4, %6 : vector<256x16xf32>
    %8 = arith.truncf %7 : vector<256x16xf32> to vector<256x16xbf16>
    %c0_5 = arith.constant 0 : index
    %c0_6 = arith.constant 0 : index
    %9 = vector.load %arg4[%c0_5, %c0_6] : memref<16x32xbf16, #tpu.memory_space<vmem>>, vector<16x32xbf16>
    %cst_7 = arith.constant dense<0.000000e+00> : vector<256x32xf32>
    %10 = tpu.matmul %8, %9, %cst_7 {dimension_numbers = #tpu.dot_dimension_numbers<[1], [0], [0], [1], [0, 0, 1, 1], [], []>} : vector<256x16xbf16>, vector<16x32xbf16>, vector<256x32xf32> -> vector<256x32xf32>
    %c0_8 = arith.constant 0 : index
    %c0_9 = arith.constant 0 : index
    %11 = vector.load %arg5[%c0_8, %c0_9] : memref<1x32xf32, #tpu.memory_space<vmem>>, vector<1x32xf32>
    %12 = vector.broadcast %11 : vector<1x32xf32> to vector<256x32xf32>
    %13 = arith.addf %10, %12 : vector<256x32xf32>
    %cst_10 = arith.constant 0.000000e+00 : f32
    %14 = vector.broadcast %cst_10 : f32 to vector<256x32xf32>
    %15 = arith.maximumf %13, %14 : vector<256x32xf32>
    %16 = arith.truncf %15 : vector<256x32xf32> to vector<256x32xbf16>
    %c0_11 = arith.constant 0 : index
    %c0_12 = arith.constant 0 : index
    %17 = vector.load %arg6[%c0_11, %c0_12] : memref<256x32xbf16, #tpu.memory_space<vmem>>, vector<256x32xbf16>
    tpu.vector_store %arg6[%c0_11, %c0_12], %16 {strides = array<i32>} : memref<256x32xbf16, #tpu.memory_space<vmem>>, vector<256x32xbf16>,
    return
  }
  func.func @transform_0(%arg0: i32) -> (i32, i32) {
    %c0_i32 = arith.constant 0 : i32
    %c0_i32_0 = arith.constant 0 : i32
    return %arg0, %c0_i32 : i32, i32
  }
  func.func @transform_1(%arg0: i32) -> (i32, i32) {
    %c0_i32 = arith.constant 0 : i32
    %c0_i32_0 = arith.constant 0 : i32
    return %arg0, %c0_i32 : i32, i32
  }
  func.func @transform_2(%arg0: i32) -> (i32, i32) {
    %c0_i32 = arith.constant 0 : i32
    %c0_i32_0 = arith.constant 0 : i32
    %c0_i32_1 = arith.constant 0 : i32
    return %c0_i32, %c0_i32_0 : i32, i32
  }
  func.func @transform_3(%arg0: i32) -> (i32, i32) {
    %c0_i32 = arith.constant 0 : i32
    %c0_i32_0 = arith.constant 0 : i32
    %c0_i32_1 = arith.constant 0 : i32
    return %c0_i32, %c0_i32_0 : i32, i32
  }
  func.func @transform_4(%arg0: i32) -> (i32, i32) {
    %c0_i32 = arith.constant 0 : i32
    %c0_i32_0 = arith.constant 0 : i32
    %c0_i32_1 = arith.constant 0 : i32
    return %c0_i32, %c0_i32_0 : i32, i32
  }
  func.func @transform_5(%arg0: i32) -> (i32, i32) {
    %c0_i32 = arith.constant 0 : i32
    %c0_i32_0 = arith.constant 0 : i32
    return %arg0, %c0_i32 : i32, i32
  }
}

</mosaic_0001>

<bundles_post_ra>
// kernel: node_classifier_forward.2
= control target key start
LH: loop header
LB: loop body
LE: loop exit
PB: predicated region body
PF: predicated region fallthrough
CT: control target
= control target key end

     0   :  { %v1317_v1 = vmov 0   ;;  %vm613_vm0 = vcmask 130048   ;;  %vm983_vm1 = vcmask 257024   ;;  %s1820_s2 = inlined_call_operand.vmem [shape: bf16[256,16], index: 2, kind: input, shape index: {}]   ;;  %s1821_s0 = inlined_call_operand.vmem [shape: s8[256,256], index: 0, kind: input, shape index: {}]   ;;  %s1822_s1 = inlined_call_operand.vmem [shape: f32[256,1], index: 1, kind: input, shape index: {}]   ;;  %s1823_s3 = inlined_call_operand.vmem [shape: bf16[16,32], index: 3, kind: input, shape index: {}]   ;;  %s1824_s4 = inlined_call_operand.vmem [shape: f32[1,32], index: 4, kind: input, shape index: {}]   ;;  %s1825_s5 = inlined_call_operand.vmem [shape: bf16[256,32], index: 5, kind: output, shape index: {}]  }
   0x1   :  { %v1300_v0 = vld [vmem:[%s1820_s2 + $0x40] sm:$0xff]   ;;  %1299 = vset.pattern.permute.xlu1 %v1317_v1  ;;  %1298 = vset.pattern.permute.xlu0 %v1317_v1  ;;  %v1302_v3 = vld [vmem:[%s1820_s2 + $0x48] sm:$0xff]   ;;  %v1304_v5 = vld [vmem:[%s1820_s2 + $0x50] sm:$0xff]  }
   0x2   :  { %v1301_v2 = vld [vmem:[%s1820_s2] sm:$0xff]   ;;  %1118 = vmatprep.subr.bf16.mxu0 %v1300_v0  ;;  %1281 = vmatprep.subr.bf16.mxu1 %v1300_v0  ;;  %v1303_v4 = vld [vmem:[%s1820_s2 + $0x8] sm:$0xff]   ;;  %v1305_v6 = vld [vmem:[%s1820_s2 + $0x10] sm:$0xff]  }
   0x3   :  { %1119 = vmatpush3.bf16.msra.mxu0 %v1301_v2  ;;  %1289 = vmatpush3.bf16.msra.mxu1 %v1301_v2  ;;  %v1306_v7 = vld [vmem:[%s1820_s2 + $0x58] sm:$0xff]   ;;  %v1308_v9 = vld [vmem:[%s1820_s2 + $0x60] sm:$0xff]   ;;  %v1310_v11 = vld [vmem:[%s1820_s2 + $0x68] sm:$0xff]  }
   0x4   :  { %1120 = vmatprep.subr.bf16.mxu0 %v1302_v3  ;;  %1282 = vmatprep.subr.bf16.mxu1 %v1302_v3  ;;  %v1307_v8 = vld [vmem:[%s1820_s2 + $0x18] sm:$0xff]   ;;  %v1309_v10 = vld [vmem:[%s1820_s2 + $0x20] sm:$0xff]   ;;  %v22_v12 = vld [vmem:[%s1821_s0 + $0x8] sm:$0xff] }
   0x5   :  { %v38_v13 = vunpack.c.l.s8.bf16 %v22_v12  ;;  %v34_v14 = vld [vmem:[%s1821_s0 + $0x68] sm:$0xff]  ;;  %v1312_v17 = vld [vmem:[%s1820_s2 + $0x70] sm:$0xff]   ;;  %v358_v19 = vld [vmem:[%s1822_s1] sm:$0xff]  ;;  %v40_v30 = vunpack.c.h.s8.bf16 %v22_v12 }
   0x6   :  { %v62_v15 = vunpack.c.l.s8.bf16 %v34_v14  ;;  %v1311_v16 = vld [vmem:[%s1820_s2 + $0x28] sm:$0xff]   ;;  %v360_v18 = vld [vmem:[%s1822_s1 + $0x10] sm:$0xff]  ;;  %392 = vperm.xlu0 %1298, %v358_v19   ;;  %v361_v21 = vld [vmem:[%s1822_s1 + $0x18] sm:$0xff]  ;;  %v64_v33 = vunpack.c.h.s8.bf16 %v34_v14 }
   0x7   :  { %1121 = vmatpush3.bf16.msra.mxu0 %v1303_v4  ;;  %1290 = vmatpush3.bf16.msra.mxu1 %v1303_v4  ;;  %v1313_v20 = vld [vmem:[%s1820_s2 + $0x30] sm:$0xff]   ;;  %v359_v22 = vld [vmem:[%s1822_s1 + $0x8] sm:$0xff]  ;;  %v1314_v23 = vld [vmem:[%s1820_s2 + $0x78] sm:$0xff]  }
   0x8   :  { %1122 = vmatprep.subr.bf16.mxu0 %v1304_v5  ;;  %1283 = vmatprep.subr.bf16.mxu1 %v1304_v5  ;;  %v1315_v24 = vld [vmem:[%s1820_s2 + $0x38] sm:$0xff]   ;;  %v21_v25 = vld [vmem:[%s1821_s0] sm:$0xff]  ;;  %v363_v26 = vld [vmem:[%s1822_s1 + $0x28] sm:$0xff] }
   0x9   :  { %229 = vmatprep.mubr.bf16.mxu0 %v38_v13  ;;  %325 = vmatprep.mubr.bf16.mxu1 %v62_v15  ;;  %v362_v27 = vld [vmem:[%s1822_s1 + $0x20] sm:$0xff]  ;;  %v37_v29 = vunpack.c.l.s8.bf16 %v21_v25  ;;  %v365_v32 = vld [vmem:[%s1822_s1 + $0x38] sm:$0xff]  ;;  %v364_v34 = vld [vmem:[%s1822_s1 + $0x30] sm:$0xff]  ;;  %v39_v39 = vunpack.c.h.s8.bf16 %v21_v25 }
   0xa   :  { %402 = vperm.xlu1 %1299, %v360_v18   ;;  %397 = vperm.xlu0 %1298, %v359_v22   ;;  %v33_v28 = vld [vmem:[%s1821_s0 + $0x60] sm:$0xff]  ;;  %v367_v35 = vld [vmem:[%s1822_s1 + $0x48] sm:$0xff]  ;;  %v24_v36 = vld [vmem:[%s1821_s0 + $0x18] sm:$0xff] }
   0xb   :  { %1123 = vmatpush3.bf16.msra.mxu0 %v1305_v6  ;;  %1291 = vmatpush3.bf16.msra.mxu1 %v1305_v6  ;;  %v61_v31 = vunpack.c.l.s8.bf16 %v33_v28  ;;  %v36_v37 = vld [vmem:[%s1821_s0 + $0x78] sm:$0xff]  ;;  %v366_v38 = vld [vmem:[%s1822_s1 + $0x40] sm:$0xff]  ;;  %v42_v40 = vunpack.c.l.s8.bf16 %v24_v36  ;;  %v63_v41 = vunpack.c.h.s8.bf16 %v33_v28  ;;  %v368_v44 = vld [vmem:[%s1822_s1 + $0x50] sm:$0xff]  ;;  %v44_v50 = vunpack.c.h.s8.bf16 %v24_v36 }
   0xc   :  { %1124 = vmatprep.subr.bf16.mxu0 %v1306_v7  ;;  %1284 = vmatprep.subr.bf16.mxu1 %v1306_v7  ;;  %v369_v42 = vld [vmem:[%s1822_s1 + $0x58] sm:$0xff]  ;;  %v66_v43 = vunpack.c.l.s8.bf16 %v36_v37  ;;  %v23_v45 = vld [vmem:[%s1821_s0 + $0x10] sm:$0xff]  ;;  %v371_v46 = vld [vmem:[%s1822_s1 + $0x68] sm:$0xff]  ;;  %v68_v53 = vunpack.c.h.s8.bf16 %v36_v37 }
   0xd   :  { %v35_v47 = vld [vmem:[%s1821_s0 + $0x70] sm:$0xff]  ;;  %v370_v48 = vld [vmem:[%s1822_s1 + $0x60] sm:$0xff]  ;;  %v41_v49 = vunpack.c.l.s8.bf16 %v23_v45  ;;  %v373_v52 = vld [vmem:[%s1822_s1 + $0x78] sm:$0xff]  ;;  %v43_v58 = vunpack.c.h.s8.bf16 %v23_v45 }
   0xe   :  { %407 = vperm.xlu1 %1299, %v361_v21   ;;  %412 = vperm.xlu0 %1298, %v362_v27   ;;  %v65_v51 = vunpack.c.l.s8.bf16 %v35_v47  ;;  %v372_v54 = vld [vmem:[%s1822_s1 + $0x70] sm:$0xff]  ;;  %v375_v55 = vld [vmem:[%s1822_s1 + $0x88] sm:$0xff]  ;;  %v374_v57 = vld [vmem:[%s1822_s1 + $0x80] sm:$0xff]  ;;  %v67_v60 = vunpack.c.h.s8.bf16 %v35_v47 }
   0xf   :  { %1125 = vmatpush3.bf16.msra.mxu0 %v1307_v8  ;;  %1292 = vmatpush3.bf16.msra.mxu1 %v1307_v8  ;;  %v26_v56 = vld [vmem:[%s1821_s0 + $0x28] sm:$0xff]  ;;  %v377_v61 = vld [vmem:[%s1822_s1 + $0x98] sm:$0xff]  ;;  %v376_v62 = vld [vmem:[%s1822_s1 + $0x90] sm:$0xff] }
  0x10   :  { %1126 = vmatprep.subr.bf16.mxu0 %v1308_v9  ;;  %1285 = vmatprep.subr.bf16.mxu1 %v1308_v9  ;;  %v46_v59 = vunpack.c.l.s8.bf16 %v26_v56  ;;  %v25_v63 = vld [vmem:[%s1821_s0 + $0x20] sm:$0xff]  ;;  %v379_v0 = vld [vmem:[%s1822_s1 + $0xa8] sm:$0xff]  ;;  %v48_v3 = vunpack.c.h.s8.bf16 %v26_v56  ;;  %v381_v4 = vld [vmem:[%s1822_s1 + $0xb8] sm:$0xff] }
  0x11   :  { %v378_v1 = vld [vmem:[%s1822_s1 + $0xa0] sm:$0xff]  ;;  %v45_v2 = vunpack.c.l.s8.bf16 %v25_v63  ;;  %v380_v5 = vld [vmem:[%s1822_s1 + $0xb0] sm:$0xff]  ;;  %v383_v6 = vld [vmem:[%s1822_s1 + $0xc8] sm:$0xff]  ;;  %v47_v9 = vunpack.c.h.s8.bf16 %v25_v63 }
  0x12   :  { %417 = vperm.xlu1 %1299, %v363_v26   ;;  %422 = vperm.xlu0 %1298, %v364_v34   ;;  %v28_v7 = vld [vmem:[%s1821_s0 + $0x38] sm:$0xff]  ;;  %v382_v8 = vld [vmem:[%s1822_s1 + $0xc0] sm:$0xff]  ;;  %v384_v12 = vld [vmem:[%s1822_s1 + $0xd0] sm:$0xff] }
  0x13   :  { %1127 = vmatpush3.bf16.msra.mxu0 %v1309_v10  ;;  %1293 = vmatpush3.bf16.msra.mxu1 %v1309_v10  ;;  %v50_v10 = vunpack.c.l.s8.bf16 %v28_v7  ;;  %v27_v13 = vld [vmem:[%s1821_s0 + $0x30] sm:$0xff]  ;;  %v387_v14 = vld [vmem:[%s1822_s1 + $0xe8] sm:$0xff]  ;;  %v386_v15 = vld [vmem:[%s1822_s1 + $0xe0] sm:$0xff] }
  0x14   :  { %1128 = vmatprep.subr.bf16.mxu0 %v1310_v11  ;;  %1286 = vmatprep.subr.bf16.mxu1 %v1310_v11  ;;  %v385_v11 = vld [vmem:[%s1822_s1 + $0xd8] sm:$0xff]  ;;  %v388_v19 = vld [vmem:[%s1822_s1 + $0xf0] sm:$0xff]  ;;  %v51_v21 = vunpack.c.h.s8.bf16 %v27_v13 }
  0x15   :  { %v389_v18 = vld [vmem:[%s1822_s1 + $0xf8] sm:$0xff] }
  0x16   :  { %427 = vperm.xlu1 %1299, %v365_v32   ;;  %432 = vperm.xlu0 %1298, %v366_v38   ;;  %v32_v26 = vld [vmem:[%s1821_s0 + $0x58] sm:$0xff] }
  0x17   :  { %1129 = vmatpush3.bf16.msra.mxu0 %v1311_v16  ;;  %1294 = vmatpush3.bf16.msra.mxu1 %v1311_v16  ;;  %v49_v16 = vunpack.c.l.s8.bf16 %v27_v13  ;;  %v58_v28 = vunpack.c.l.s8.bf16 %v32_v26 }
  0x18   :  { %1130 = vmatprep.subr.bf16.mxu0 %v1312_v17  ;;  %1287 = vmatprep.subr.bf16.mxu1 %v1312_v17  ;;  %v52_v17 = vunpack.c.h.s8.bf16 %v28_v7 }
  0x1a   :  { %437 = vperm.xlu1 %1299, %v367_v35   ;;  %442 = vperm.xlu0 %1298, %v368_v44  }
  0x1b   :  { %1131 = vmatpush3.bf16.msra.mxu0 %v1313_v20  ;;  %1295 = vmatpush3.bf16.msra.mxu1 %v1313_v20  ;;  %v30_v20 = vld [vmem:[%s1821_s0 + $0x48] sm:$0xff] }
  0x1c   :  { %1132 = vmatprep.subr.bf16.mxu0 %v1314_v23  ;;  %1288 = vmatprep.subr.bf16.mxu1 %v1314_v23  ;;  %v54_v22 = vunpack.c.l.s8.bf16 %v30_v20  ;;  %v29_v23 = vld [vmem:[%s1821_s0 + $0x40] sm:$0xff]  ;;  %v56_v25 = vunpack.c.h.s8.bf16 %v30_v20 }
  0x1d   :  { %v55_v27 = vunpack.c.h.s8.bf16 %v29_v23 }
  0x1e   :  { %447 = vperm.xlu1 %1299, %v369_v42   ;;  %452 = vperm.xlu0 %1298, %v370_v48  }
  0x1f   :  { %1133 = vmatpush3.bf16.msra.mxu0 %v1315_v24  ;;  %1296 = vmatpush3.bf16.msra.mxu1 %v1315_v24  ;;  %v53_v24 = vunpack.c.l.s8.bf16 %v29_v23 }
  0x22   :  { %230 = vmatmul.mubr.bf16.vlgmr.msra.gmra.mrb[0].mxu0 %v37_v29  ;;  %326 = vmatmul.mubr.bf16.vlgmr.msra.gmra.mrb[0].mxu1 %v61_v31  ;;  %v31_v29 = vld [vmem:[%s1821_s0 + $0x50] sm:$0xff]  ;;  %v60_v31 = vunpack.c.h.s8.bf16 %v32_v26 }
  0x23   :  { %237 = vmatprep.mubr.bf16.mxu0 %v40_v30  ;;  %333 = vmatprep.mubr.bf16.mxu1 %v64_v33  ;;  %v57_v30 = vunpack.c.l.s8.bf16 %v31_v29  ;;  %v59_v32 = vunpack.c.h.s8.bf16 %v31_v29  ;;  %v1316_v33 = vld [vmem:[%s1823_s3] sm:$0xff]  }
  0x24   :  { %457 = vperm.xlu1 %1299, %v371_v46   ;;  %462 = vperm.xlu0 %1298, %v372_v54  }
  0x25   :  { %1247 = vmatprep.subr.bf16.mxu1 %v1316_v33 }
  0x26   :  { %1248 = vmatpush3.bf16.msra.mxu1 %v1316_v33 }
  0x28   :  { %467 = vperm.xlu1 %1299, %v373_v52   ;;  %472 = vperm.xlu0 %1298, %v374_v57  }
  0x2a   :  { %238 = vmatmul.mubr.bf16.gmra.mrb[4].mxu0 %v39_v39  ;;  %334 = vmatmul.mubr.bf16.gmra.mrb[4].mxu1 %v63_v41 }
  0x2b   :  { %245 = vmatprep.mubr.bf16.mxu0 %v42_v40  ;;  %341 = vmatprep.mubr.bf16.mxu1 %v66_v43 }
  0x2c   :  { %477 = vperm.xlu1 %1299, %v375_v55   ;;  %482 = vperm.xlu0 %1298, %v376_v62  }
  0x30   :  { %487 = vperm.xlu1 %1299, %v377_v61   ;;  %492 = vperm.xlu0 %1298, %v378_v1  }
  0x32   :  { %246 = vmatmul.mubr.bf16.gmra.mrb[8].mxu0 %v41_v49  ;;  %342 = vmatmul.mubr.bf16.gmra.mrb[8].mxu1 %v65_v51 }
  0x33   :  { %253 = vmatprep.mubr.bf16.mxu0 %v44_v50  ;;  %349 = vmatprep.mubr.bf16.mxu1 %v68_v53 }
  0x34   :  { %497 = vperm.xlu1 %1299, %v379_v0   ;;  %502 = vperm.xlu0 %1298, %v380_v5  }
  0x38   :  { %507 = vperm.xlu1 %1299, %v381_v4   ;;  %512 = vperm.xlu0 %1298, %v382_v8  }
  0x3a   :  { %254 = vmatmul.mubr.bf16.gmra.mrb[12].mxu0 %v43_v58  ;;  %350 = vmatmul.mubr.bf16.gmra.mrb[12].mxu1 %v67_v60 }
  0x3b   :  { %261 = vmatprep.mubr.bf16.mxu0 %v46_v59 }
  0x3c   :  { %517 = vperm.xlu1 %1299, %v383_v6   ;;  %522 = vperm.xlu0 %1298, %v384_v12  }
  0x40   :  { %527 = vperm.xlu1 %1299, %v385_v11   ;;  %532 = vperm.xlu0 %1298, %v386_v15  }
  0x42   :  { %262 = vmatmul.mubr.bf16.gmra.mrb[16].mxu0 %v45_v2 }
  0x43   :  { %269 = vmatprep.mubr.bf16.mxu0 %v48_v3 }
  0x44   :  { %537 = vperm.xlu1 %1299, %v387_v14   ;;  %542 = vperm.xlu0 %1298, %v388_v19  }
  0x48   :  { %547 = vperm.xlu1 %1299, %v389_v18  }
  0x4a   :  { %270 = vmatmul.mubr.bf16.gmra.mrb[20].mxu0 %v47_v9 }
  0x4b   :  { %277 = vmatprep.mubr.bf16.mxu0 %v50_v10 }
  0x52   :  { %278 = vmatmul.mubr.bf16.gmra.mrb[24].mxu0 %v49_v16 }
  0x53   :  { %285 = vmatprep.mubr.bf16.mxu0 %v52_v17 }
  0x5a   :  { %286 = vmatmul.mubr.bf16.gmra.mrb[28].mxu0 %v51_v21 }
  0x5b   :  { %293 = vmatprep.mubr.bf16.mxu0 %v54_v22 }
  0x62   :  { %294 = vmatmul.mubr.bf16.gmra.mrb[32].mxu0 %v53_v24 }
  0x63   :  { %301 = vmatprep.mubr.bf16.mxu0 %v56_v25 }
  0x6a   :  { %302 = vmatmul.mubr.bf16.gmra.mrb[36].mxu0 %v55_v27 }
  0x6b   :  { %309 = vmatprep.mubr.bf16.mxu0 %v58_v28 }
  0x72   :  { %310 = vmatmul.mubr.bf16.gmra.mrb[40].mxu0 %v57_v30 }
  0x73   :  { %317 = vmatprep.mubr.bf16.mxu0 %v60_v31 }
  0x7a   :  { %318 = vmatmul.mubr.bf16.gmra.mrb[44].mxu0 %v59_v32 }
  0x85   :  { %v393_v34 = vpop.permute.xlu0 %392 }
  0x89   :  { %v403_v35 = vpop.permute.xlu1 %402  ;;  %v398_v36 = vpop.permute.xlu0 %397 }
  0x8d   :  { %v408_v37 = vpop.permute.xlu1 %407  ;;  %v1543_v38 = vpop.permute.xlu0 %412 }
  0x91   :  { %v1545_v39 = vpop.permute.xlu1 %417  ;;  %v1547_v40 = vpop.permute.xlu0 %422 }
  0x95   :  { %v1549_v41 = vpop.permute.xlu1 %427  ;;  %v1551_v42 = vpop.permute.xlu0 %432 }
  0x99   :  { %v1553_v43 = vpop.permute.xlu1 %437  ;;  %v1555_v44 = vpop.permute.xlu0 %442 }
  0x9d   :  { %v1557_v45 = vpop.permute.xlu1 %447  ;;  %v1559_v46 = vpop.permute.xlu0 %452 }
  0xa3   :  { %v1561_v47 = vpop.permute.xlu1 %457  ;;  %v1563_v48 = vpop.permute.xlu0 %462 }
  0xa7   :  { %v1565_v49 = vpop.permute.xlu1 %467  ;;  %v1567_v50 = vpop.permute.xlu0 %472 }
  0xab   :  { %v1569_v51 = vpop.permute.xlu1 %477  ;;  %v1571_v52 = vpop.permute.xlu0 %482 }
  0xaf   :  { %v1573_v53 = vpop.permute.xlu1 %487  ;;  %v1575_v54 = vpop.permute.xlu0 %492 }
  0xb3   :  { %v1577_v55 = vpop.permute.xlu1 %497  ;;  %v1579_v56 = vpop.permute.xlu0 %502 }
  0xb7   :  { %v1581_v57 = vpop.permute.xlu1 %507  ;;  %v513_v59 = vpop.permute.xlu0 %512 }
  0xbb   :  { %v518_v10 = vpop.permute.xlu1 %517  ;;  %v523_v14 = vpop.permute.xlu0 %522 }
  0xbf   :  { %v528_v30 = vpop.permute.xlu1 %527 }
  0xf5   :  { %v1134_v58 = vpop.f32.mrb[0].mxu0  ;;  %v1206_v61 = vpop.f32.mrb[0].mxu1 }
  0xf6   :  { %v1135_v60 = vpop.f32.mrb[1].mxu0  ;;  %v1207_v0 = vpop.f32.mrb[1].mxu1 }
  0xf7   :  { %v1136_v62 = vadd.f32 %v1135_v60, %v1134_v58  ;;  %v1137_v63 = vpop.f32.mrb[2].mxu0  ;;  %v1208_v2 = vadd.f32 %v1207_v0, %v1206_v61  ;;  %v1209_v3 = vpop.f32.mrb[2].mxu1 }
  0xf8   :  { %v1138_v1 = vpop.f32.mrb[3].mxu0  ;;  %v1210_v5 = vpop.f32.mrb[3].mxu1 }
  0xf9   :  { %v1139_v4 = vadd.f32 %v1138_v1, %v1137_v63  ;;  %v1211_v6 = vadd.f32 %v1210_v5, %v1209_v3  ;;  %v1583_v7 = vmul.f32 %v1208_v2, %v513_v59  ;;  %v550_v8 = vmul.f32 %v1136_v62, %v393_v34  ;;  %v533_v34 = vpop.permute.xlu0 %532 }
  0xfb   :  { %v551_v9 = vmul.f32 %v1139_v4, %v398_v36  ;;  %v1585_v11 = vmul.f32 %v1211_v6, %v518_v10  ;;  %v538_v6 = vpop.permute.xlu1 %537 }
  0xfd   :  { %v582_v12 = vpack.c.bf16 %v551_v9, %v550_v8  ;;  %v1140_v13 = vpop.f32.mrb[4].mxu0  ;;  %v1212_v16 = vpop.f32.mrb[4].mxu1  ;;  %v594_v17 = vpack.c.bf16 %v1585_v11, %v1583_v7 }
  0xfe   :  { %v1141_v15 = vpop.f32.mrb[5].mxu0  ;;  %v1213_v20 = vpop.f32.mrb[5].mxu1 }
  0xff   :  { %v1142_v18 = vadd.f32 %v1141_v15, %v1140_v13  ;;  %v1143_v19 = vpop.f32.mrb[6].mxu0  ;;  %1249 = vmatprep.mubr.msk.bf16.mxu1 %vm613_vm0, %v582_v12  ;;  %v1214_v22 = vadd.f32 %v1213_v20, %v1212_v16  ;;  %v1215_v23 = vpop.f32.mrb[6].mxu1 }
 0x100   :  { %v1144_v21 = vpop.f32.mrb[7].mxu0  ;;  %v1216_v25 = vpop.f32.mrb[7].mxu1 }
 0x101   :  { %v1145_v24 = vadd.f32 %v1144_v21, %v1143_v19  ;;  %v1217_v26 = vadd.f32 %v1216_v25, %v1215_v23  ;;  %v1590_v27 = vmul.f32 %v1214_v22, %v523_v14  ;;  %v552_v28 = vmul.f32 %v1142_v18, %v403_v35  ;;  %v543_v12 = vpop.permute.xlu0 %542  ;;  %v548_v23 = vpop.permute.xlu1 %547 }
 0x103   :  { %v553_v29 = vmul.f32 %v1145_v24, %v408_v37  ;;  %v1592_v31 = vmul.f32 %v1217_v26, %v528_v30 }
 0x105   :  { %v583_v32 = vpack.c.bf16 %v553_v29, %v552_v28  ;;  %v1146_v33 = vpop.f32.mrb[8].mxu0  ;;  %v1218_v58 = vpop.f32.mrb[8].mxu1  ;;  %v595_v59 = vpack.c.bf16 %v1592_v31, %v1590_v27 }
 0x106   :  { %v1147_v36 = vpop.f32.mrb[9].mxu0  ;;  %v1219_v62 = vpop.f32.mrb[9].mxu1 }
 0x107   :  { %v1148_v60 = vadd.f32 %v1147_v36, %v1146_v33  ;;  %v1149_v61 = vpop.f32.mrb[10].mxu0  ;;  %1250 = vmatmul.mubr.msk.bf16.vlgmr.msra.gmra.mrb[16].mxu1 %vm613_vm0, %v583_v32  ;;  %v1220_v0 = vadd.f32 %v1219_v62, %v1218_v58  ;;  %v1221_v35 = vpop.f32.mrb[10].mxu1 }
 0x108   :  { %v1150_v63 = vpop.f32.mrb[11].mxu0  ;;  %v1222_v1 = vpop.f32.mrb[11].mxu1 }
 0x109   :  { %v1151_v37 = vadd.f32 %v1150_v63, %v1149_v61  ;;  %v1223_v2 = vadd.f32 %v1222_v1, %v1221_v35  ;;  %v1597_v3 = vmul.f32 %v1220_v0, %v533_v34  ;;  %v554_v4 = vmul.f32 %v1148_v60, %v1543_v38 }
 0x10b   :  { %v555_v5 = vmul.f32 %v1151_v37, %v1545_v39  ;;  %v1601_v8 = vmul.f32 %v1223_v2, %v538_v6 }
 0x10d   :  { %v584_v9 = vpack.c.bf16 %v555_v5, %v554_v4  ;;  %v1152_v10 = vpop.f32.mrb[12].mxu0  ;;  %v1224_v14 = vpop.f32.mrb[12].mxu1  ;;  %v596_v15 = vpack.c.bf16 %v1601_v8, %v1597_v3 }
 0x10e   :  { %v1153_v13 = vpop.f32.mrb[13].mxu0  ;;  %v1225_v19 = vpop.f32.mrb[13].mxu1 }
 0x10f   :  { %v1154_v16 = vadd.f32 %v1153_v13, %v1152_v10  ;;  %v1155_v18 = vpop.f32.mrb[14].mxu0  ;;  %1253 = vmatprep.mubr.msk.bf16.mxu1 %vm613_vm0, %v584_v9  ;;  %v1226_v38 = vadd.f32 %v1225_v19, %v1224_v14  ;;  %v1227_v21 = vpop.f32.mrb[14].mxu1 }
 0x110   :  { %v1156_v20 = vpop.f32.mrb[15].mxu0  ;;  %v1228_v22 = vpop.f32.mrb[15].mxu1 }
 0x111   :  { %v1157_v39 = vadd.f32 %v1156_v20, %v1155_v18  ;;  %v1229_v24 = vadd.f32 %v1228_v22, %v1227_v21  ;;  %v1606_v25 = vmul.f32 %v1226_v38, %v543_v12  ;;  %v556_v26 = vmul.f32 %v1154_v16, %v1547_v40 }
 0x113   :  { %v557_v28 = vmul.f32 %v1157_v39, %v1549_v41  ;;  %v1610_v29 = vmul.f32 %v1229_v24, %v548_v23 }
 0x115   :  { %v585_v30 = vpack.c.bf16 %v557_v28, %v556_v26  ;;  %v1158_v32 = vpop.f32.mrb[16].mxu0  ;;  %v597_v34 = vpack.c.bf16 %v1610_v29, %v1606_v25 }
 0x116   :  { %v1159_v33 = vpop.f32.mrb[17].mxu0 }
 0x117   :  { %v1160_v36 = vadd.f32 %v1159_v33, %v1158_v32  ;;  %v1161_v58 = vpop.f32.mrb[18].mxu0  ;;  %1254 = vmatmul.mubr.msk.bf16.gmra.mrb[20].mxu1 %vm613_vm0, %v585_v30 }
 0x118   :  { %v1162_v60 = vpop.f32.mrb[19].mxu0 }
 0x119   :  { %v1163_v61 = vadd.f32 %v1162_v60, %v1161_v58  ;;  %v558_v62 = vmul.f32 %v1160_v36, %v1551_v42 }
 0x11b   :  { %v559_v40 = vmul.f32 %v1163_v61, %v1553_v43 }
 0x11d   :  { %v586_v63 = vpack.c.bf16 %v559_v40, %v558_v62  ;;  %v1164_v41 = vpop.f32.mrb[20].mxu0 }
 0x11e   :  { %v1165_v0 = vpop.f32.mrb[21].mxu0 }
 0x11f   :  { %v1166_v35 = vadd.f32 %v1165_v0, %v1164_v41  ;;  %v1167_v37 = vpop.f32.mrb[22].mxu0  ;;  %1257 = vmatprep.mubr.msk.bf16.mxu1 %vm613_vm0, %v586_v63 }
 0x120   :  { %v1168_v1 = vpop.f32.mrb[23].mxu0 }
 0x121   :  { %v1169_v2 = vadd.f32 %v1168_v1, %v1167_v37  ;;  %v560_v4 = vmul.f32 %v1166_v35, %v1555_v44 }
 0x123   :  { %v561_v5 = vmul.f32 %v1169_v2, %v1557_v45 }
 0x125   :  { %v587_v6 = vpack.c.bf16 %v561_v5, %v560_v4  ;;  %v1170_v9 = vpop.f32.mrb[24].mxu0 }
 0x126   :  { %v1171_v10 = vpop.f32.mrb[25].mxu0 }
 0x127   :  { %v1172_v12 = vadd.f32 %v1171_v10, %v1170_v9  ;;  %v1173_v42 = vpop.f32.mrb[26].mxu0  ;;  %1258 = vmatmul.mubr.msk.bf16.gmra.mrb[24].mxu1 %vm613_vm0, %v587_v6 }
 0x128   :  { %v1174_v43 = vpop.f32.mrb[27].mxu0 }
 0x129   :  { %v1175_v13 = vadd.f32 %v1174_v43, %v1173_v42  ;;  %v562_v14 = vmul.f32 %v1172_v12, %v1559_v46 }
 0x12b   :  { %v563_v16 = vmul.f32 %v1175_v13, %v1561_v47 }
 0x12d   :  { %v588_v18 = vpack.c.bf16 %v563_v16, %v562_v14  ;;  %v1176_v19 = vpop.f32.mrb[28].mxu0 }
 0x12e   :  { %v1177_v20 = vpop.f32.mrb[29].mxu0 }
 0x12f   :  { %v1178_v38 = vadd.f32 %v1177_v20, %v1176_v19  ;;  %v1179_v44 = vpop.f32.mrb[30].mxu0  ;;  %1261 = vmatprep.mubr.msk.bf16.mxu1 %vm613_vm0, %v588_v18 }
 0x130   :  { %v1180_v45 = vpop.f32.mrb[31].mxu0 }
 0x131   :  { %v1181_v21 = vadd.f32 %v1180_v45, %v1179_v44  ;;  %v564_v39 = vmul.f32 %v1178_v38, %v1563_v48 }
 0x133   :  { %v565_v22 = vmul.f32 %v1181_v21, %v1565_v49 }
 0x135   :  { %v589_v23 = vpack.c.bf16 %v565_v22, %v564_v39  ;;  %v1182_v24 = vpop.f32.mrb[32].mxu0 }
 0x136   :  { %v1183_v26 = vpop.f32.mrb[33].mxu0 }
 0x137   :  { %v1184_v28 = vadd.f32 %v1183_v26, %v1182_v24  ;;  %v1185_v46 = vpop.f32.mrb[34].mxu0  ;;  %1262 = vmatmul.mubr.msk.bf16.gmra.mrb[28].mxu1 %vm613_vm0, %v589_v23 }
 0x138   :  { %v1186_v47 = vpop.f32.mrb[35].mxu0 }
 0x139   :  { %v1187_v30 = vadd.f32 %v1186_v47, %v1185_v46  ;;  %v566_v32 = vmul.f32 %v1184_v28, %v1567_v50 }
 0x13b   :  { %v567_v33 = vmul.f32 %v1187_v30, %v1569_v51 }
 0x13d   :  { %v590_v36 = vpack.c.bf16 %v567_v33, %v566_v32  ;;  %v1188_v58 = vpop.f32.mrb[36].mxu0 }
 0x13e   :  { %v1189_v60 = vpop.f32.mrb[37].mxu0 }
 0x13f   :  { %v1190_v61 = vadd.f32 %v1189_v60, %v1188_v58  ;;  %v1191_v48 = vpop.f32.mrb[38].mxu0  ;;  %1265 = vmatprep.mubr.msk.bf16.mxu1 %vm613_vm0, %v590_v36 }
 0x140   :  { %v1192_v49 = vpop.f32.mrb[39].mxu0 }
 0x141   :  { %v1193_v62 = vadd.f32 %v1192_v49, %v1191_v48  ;;  %v568_v40 = vmul.f32 %v1190_v61, %v1571_v52 }
 0x143   :  { %v569_v63 = vmul.f32 %v1193_v62, %v1573_v53 }
 0x145   :  { %v591_v41 = vpack.c.bf16 %v569_v63, %v568_v40  ;;  %v1194_v0 = vpop.f32.mrb[40].mxu0 }
 0x146   :  { %v1195_v35 = vpop.f32.mrb[41].mxu0 }
 0x147   :  { %v1196_v37 = vadd.f32 %v1195_v35, %v1194_v0  ;;  %v1197_v50 = vpop.f32.mrb[42].mxu0  ;;  %1266 = vmatmul.mubr.msk.bf16.gmra.mrb[32].mxu1 %vm613_vm0, %v591_v41 }
 0x148   :  { %v1198_v51 = vpop.f32.mrb[43].mxu0 }
 0x149   :  { %v1199_v1 = vadd.f32 %v1198_v51, %v1197_v50  ;;  %v570_v2 = vmul.f32 %v1196_v37, %v1575_v54  ;;  %v1658_v54 = vld [vmem:[%s1824_s4] ss:$0 sm:$0xff] }
 0x14b   :  { %v571_v4 = vmul.f32 %v1199_v1, %v1577_v55 }
 0x14d   :  { %v592_v5 = vpack.c.bf16 %v571_v4, %v570_v2  ;;  %v1200_v6 = vpop.f32.mrb[44].mxu0 }
 0x14e   :  { %v1201_v9 = vpop.f32.mrb[45].mxu0 }
 0x14f   :  { %v1202_v10 = vadd.f32 %v1201_v9, %v1200_v6  ;;  %v1203_v52 = vpop.f32.mrb[46].mxu0  ;;  %1269 = vmatprep.mubr.msk.bf16.mxu1 %vm613_vm0, %v592_v5 }
 0x150   :  { %v1204_v53 = vpop.f32.mrb[47].mxu0 }
 0x151   :  { %v1205_v12 = vadd.f32 %v1204_v53, %v1203_v52  ;;  %v572_v42 = vmul.f32 %v1202_v10, %v1579_v56 }
 0x153   :  { %v573_v43 = vmul.f32 %v1205_v12, %v1581_v57 }
 0x155   :  { %v593_v13 = vpack.c.bf16 %v573_v43, %v572_v42 }
 0x157   :  { %1270 = vmatmul.mubr.msk.bf16.gmra.mrb[36].mxu1 %vm613_vm0, %v593_v13 }
 0x158   :  { %1273 = vmatprep.mubr.msk.bf16.mxu1 %vm613_vm0, %v594_v17 }
 0x15f   :  { %1274 = vmatmul.mubr.msk.bf16.gmra.mrb[40].mxu1 %vm613_vm0, %v595_v59 }
 0x160   :  { %1277 = vmatprep.mubr.msk.bf16.mxu1 %vm613_vm0, %v596_v15 }
 0x167   :  { %1278 = vmatmul.mubr.msk.bf16.gmra.mrb[44].mxu1 %vm613_vm0, %v597_v34 }
 0x1da   :  { %v1251_v55 = vpop.f32.mrb[16].mxu1 }
 0x1db   :  { %v705_v56 = vadd.f32 %v1251_v55, %v1658_v54  ;;  %v696_v57 = vpop.f32.mrb[17].mxu1 }
 0x1dc   :  { %v697_v7 = vadd.f32 %v1658_v54, %v696_v57  ;;  %v1252_v11 = vpop.f32.mrb[18].mxu1 }
 0x1dd   :  { %v825_v17 = vmax.f32 %v705_v56, 0.0  ;;  %v708_v27 = vadd.f32 %v1252_v11, %v1658_v54  ;;  %v699_v31 = vpop.f32.mrb[19].mxu1 }
 0x1de   :  { %v823_v59 = vmax.f32 %v697_v7, 0.0  ;;  %v700_v3 = vadd.f32 %v1658_v54, %v699_v31 }
 0x1df   :  { %v1088_v8 = vpack.c.bf16 %v825_v17, %v825_v17  ;;  %v826_v15 = vmax.f32 %v708_v27, 0.0 }
 0x1e0   :  { %v1086_v25 = vpack.c.bf16 %v823_v59, %v823_v59  ;;  %v824_v29 = vmax.f32 %v700_v3, 0.0 }
 0x1e1   :  { %986 = vst.msk [vmem:[%s1825_s5 + $0x8] sm:$0xf] %vm983_vm1, %v1088_v8  ;;  %v1089_v34 = vpack.c.bf16 %v826_v15, %v826_v15 }
 0x1e2   :  { %984 = vst.msk [vmem:[%s1825_s5] sm:$0xf] %vm983_vm1, %v1086_v25  ;;  %v1087_v14 = vpack.c.bf16 %v824_v29, %v824_v29 }
 0x1e3   :  { %987 = vst.msk [vmem:[%s1825_s5 + $0xc] sm:$0xf] %vm983_vm1, %v1089_v34 }
 0x1e4   :  { %985 = vst.msk [vmem:[%s1825_s5 + $0x4] sm:$0xf] %vm983_vm1, %v1087_v14 }
 0x1ea   :  { %v1255_v16 = vpop.f32.mrb[20].mxu1 }
 0x1eb   :  { %v721_v18 = vadd.f32 %v1255_v16, %v1658_v54  ;;  %v712_v19 = vpop.f32.mrb[21].mxu1 }
 0x1ec   :  { %v713_v20 = vadd.f32 %v1658_v54, %v712_v19  ;;  %v1256_v38 = vpop.f32.mrb[22].mxu1 }
 0x1ed   :  { %v829_v44 = vmax.f32 %v721_v18, 0.0  ;;  %v724_v45 = vadd.f32 %v1256_v38, %v1658_v54  ;;  %v715_v21 = vpop.f32.mrb[23].mxu1 }
 0x1ee   :  { %v827_v39 = vmax.f32 %v713_v20, 0.0  ;;  %v716_v22 = vadd.f32 %v1658_v54, %v715_v21 }
 0x1ef   :  { %v1092_v23 = vpack.c.bf16 %v829_v44, %v829_v44  ;;  %v830_v24 = vmax.f32 %v724_v45, 0.0 }
 0x1f0   :  { %v1090_v26 = vpack.c.bf16 %v827_v39, %v827_v39  ;;  %v828_v28 = vmax.f32 %v716_v22, 0.0 }
 0x1f1   :  { %990 = vst.msk [vmem:[%s1825_s5 + $0x18] sm:$0xf] %vm983_vm1, %v1092_v23  ;;  %v1093_v46 = vpack.c.bf16 %v830_v24, %v830_v24 }
 0x1f2   :  { %988 = vst.msk [vmem:[%s1825_s5 + $0x10] sm:$0xf] %vm983_vm1, %v1090_v26  ;;  %v1091_v47 = vpack.c.bf16 %v828_v28, %v828_v28 }
 0x1f3   :  { %991 = vst.msk [vmem:[%s1825_s5 + $0x1c] sm:$0xf] %vm983_vm1, %v1093_v46 }
 0x1f4   :  { %989 = vst.msk [vmem:[%s1825_s5 + $0x14] sm:$0xf] %vm983_vm1, %v1091_v47 }
 0x1fa   :  { %v1259_v30 = vpop.f32.mrb[24].mxu1 }
 0x1fb   :  { %v737_v32 = vadd.f32 %v1259_v30, %v1658_v54  ;;  %v728_v33 = vpop.f32.mrb[25].mxu1 }
 0x1fc   :  { %v729_v36 = vadd.f32 %v1658_v54, %v728_v33  ;;  %v1260_v58 = vpop.f32.mrb[26].mxu1 }
 0x1fd   :  { %v833_v60 = vmax.f32 %v737_v32, 0.0  ;;  %v740_v61 = vadd.f32 %v1260_v58, %v1658_v54  ;;  %v731_v48 = vpop.f32.mrb[27].mxu1 }
 0x1fe   :  { %v831_v49 = vmax.f32 %v729_v36, 0.0  ;;  %v732_v62 = vadd.f32 %v1658_v54, %v731_v48 }
 0x1ff   :  { %v1096_v40 = vpack.c.bf16 %v833_v60, %v833_v60  ;;  %v834_v63 = vmax.f32 %v740_v61, 0.0 }
 0x200   :  { %v1094_v41 = vpack.c.bf16 %v831_v49, %v831_v49  ;;  %v832_v0 = vmax.f32 %v732_v62, 0.0 }
 0x201   :  { %994 = vst.msk [vmem:[%s1825_s5 + $0x28] sm:$0xf] %vm983_vm1, %v1096_v40  ;;  %v1097_v35 = vpack.c.bf16 %v834_v63, %v834_v63 }
 0x202   :  { %992 = vst.msk [vmem:[%s1825_s5 + $0x20] sm:$0xf] %vm983_vm1, %v1094_v41  ;;  %v1095_v37 = vpack.c.bf16 %v832_v0, %v832_v0 }
 0x203   :  { %995 = vst.msk [vmem:[%s1825_s5 + $0x2c] sm:$0xf] %vm983_vm1, %v1097_v35 }
 0x204   :  { %993 = vst.msk [vmem:[%s1825_s5 + $0x24] sm:$0xf] %vm983_vm1, %v1095_v37 }
 0x20a   :  { %v1263_v50 = vpop.f32.mrb[28].mxu1 }
 0x20b   :  { %v753_v51 = vadd.f32 %v1263_v50, %v1658_v54  ;;  %v744_v1 = vpop.f32.mrb[29].mxu1 }
 0x20c   :  { %v745_v2 = vadd.f32 %v1658_v54, %v744_v1  ;;  %v1264_v4 = vpop.f32.mrb[30].mxu1 }
 0x20d   :  { %v837_v5 = vmax.f32 %v753_v51, 0.0  ;;  %v756_v6 = vadd.f32 %v1264_v4, %v1658_v54  ;;  %v747_v9 = vpop.f32.mrb[31].mxu1 }
 0x20e   :  { %v835_v10 = vmax.f32 %v745_v2, 0.0  ;;  %v748_v52 = vadd.f32 %v1658_v54, %v747_v9 }
 0x20f   :  { %v1100_v53 = vpack.c.bf16 %v837_v5, %v837_v5  ;;  %v838_v12 = vmax.f32 %v756_v6, 0.0 }
 0x210   :  { %v1098_v42 = vpack.c.bf16 %v835_v10, %v835_v10  ;;  %v836_v43 = vmax.f32 %v748_v52, 0.0 }
 0x211   :  { %998 = vst.msk [vmem:[%s1825_s5 + $0x38] sm:$0xf] %vm983_vm1, %v1100_v53  ;;  %v1101_v13 = vpack.c.bf16 %v838_v12, %v838_v12 }
 0x212   :  { %996 = vst.msk [vmem:[%s1825_s5 + $0x30] sm:$0xf] %vm983_vm1, %v1098_v42  ;;  %v1099_v55 = vpack.c.bf16 %v836_v43, %v836_v43 }
 0x213   :  { %999 = vst.msk [vmem:[%s1825_s5 + $0x3c] sm:$0xf] %vm983_vm1, %v1101_v13 }
 0x214   :  { %997 = vst.msk [vmem:[%s1825_s5 + $0x34] sm:$0xf] %vm983_vm1, %v1099_v55 }
 0x21a   :  { %v1267_v56 = vpop.f32.mrb[32].mxu1 }
 0x21b   :  { %v769_v57 = vadd.f32 %v1267_v56, %v1658_v54  ;;  %v760_v7 = vpop.f32.mrb[33].mxu1 }
 0x21c   :  { %v761_v11 = vadd.f32 %v1658_v54, %v760_v7  ;;  %v1268_v17 = vpop.f32.mrb[34].mxu1 }
 0x21d   :  { %v841_v27 = vmax.f32 %v769_v57, 0.0  ;;  %v772_v31 = vadd.f32 %v1268_v17, %v1658_v54  ;;  %v763_v59 = vpop.f32.mrb[35].mxu1 }
 0x21e   :  { %v839_v3 = vmax.f32 %v761_v11, 0.0  ;;  %v764_v8 = vadd.f32 %v1658_v54, %v763_v59 }
 0x21f   :  { %v1104_v15 = vpack.c.bf16 %v841_v27, %v841_v27  ;;  %v842_v25 = vmax.f32 %v772_v31, 0.0 }
 0x220   :  { %v1102_v29 = vpack.c.bf16 %v839_v3, %v839_v3  ;;  %v840_v34 = vmax.f32 %v764_v8, 0.0 }
 0x221   :  { %1002 = vst.msk [vmem:[%s1825_s5 + $0x48] sm:$0xf] %vm983_vm1, %v1104_v15  ;;  %v1105_v14 = vpack.c.bf16 %v842_v25, %v842_v25 }
 0x222   :  { %1000 = vst.msk [vmem:[%s1825_s5 + $0x40] sm:$0xf] %vm983_vm1, %v1102_v29  ;;  %v1103_v16 = vpack.c.bf16 %v840_v34, %v840_v34 }
 0x223   :  { %1003 = vst.msk [vmem:[%s1825_s5 + $0x4c] sm:$0xf] %vm983_vm1, %v1105_v14 }
 0x224   :  { %1001 = vst.msk [vmem:[%s1825_s5 + $0x44] sm:$0xf] %vm983_vm1, %v1103_v16 }
 0x22a   :  { %v1271_v18 = vpop.f32.mrb[36].mxu1 }
 0x22b   :  { %v785_v19 = vadd.f32 %v1271_v18, %v1658_v54  ;;  %v776_v20 = vpop.f32.mrb[37].mxu1 }
 0x22c   :  { %v777_v38 = vadd.f32 %v1658_v54, %v776_v20  ;;  %v1272_v44 = vpop.f32.mrb[38].mxu1 }
 0x22d   :  { %v845_v45 = vmax.f32 %v785_v19, 0.0  ;;  %v788_v21 = vadd.f32 %v1272_v44, %v1658_v54  ;;  %v779_v39 = vpop.f32.mrb[39].mxu1 }
 0x22e   :  { %v843_v22 = vmax.f32 %v777_v38, 0.0  ;;  %v780_v23 = vadd.f32 %v1658_v54, %v779_v39 }
 0x22f   :  { %v1108_v24 = vpack.c.bf16 %v845_v45, %v845_v45  ;;  %v846_v26 = vmax.f32 %v788_v21, 0.0 }
 0x230   :  { %v1106_v28 = vpack.c.bf16 %v843_v22, %v843_v22  ;;  %v844_v46 = vmax.f32 %v780_v23, 0.0 }
 0x231   :  { %1006 = vst.msk [vmem:[%s1825_s5 + $0x58] sm:$0xf] %vm983_vm1, %v1108_v24  ;;  %v1109_v47 = vpack.c.bf16 %v846_v26, %v846_v26 }
 0x232   :  { %1004 = vst.msk [vmem:[%s1825_s5 + $0x50] sm:$0xf] %vm983_vm1, %v1106_v28  ;;  %v1107_v30 = vpack.c.bf16 %v844_v46, %v844_v46  ;;  %v1275_v32 = vpop.f32.mrb[40].mxu1 }
 0x233   :  { %1007 = vst.msk [vmem:[%s1825_s5 + $0x5c] sm:$0xf] %vm983_vm1, %v1109_v47  ;;  %v801_v33 = vadd.f32 %v1275_v32, %v1658_v54  ;;  %v792_v36 = vpop.f32.mrb[41].mxu1 }
 0x234   :  { %1005 = vst.msk [vmem:[%s1825_s5 + $0x54] sm:$0xf] %vm983_vm1, %v1107_v30  ;;  %v793_v58 = vadd.f32 %v1658_v54, %v792_v36  ;;  %v1276_v60 = vpop.f32.mrb[42].mxu1 }
 0x235   :  { %v849_v61 = vmax.f32 %v801_v33, 0.0  ;;  %v804_v48 = vadd.f32 %v1276_v60, %v1658_v54  ;;  %v795_v49 = vpop.f32.mrb[43].mxu1 }
 0x236   :  { %v847_v62 = vmax.f32 %v793_v58, 0.0  ;;  %v796_v40 = vadd.f32 %v1658_v54, %v795_v49 }
 0x237   :  { %v1112_v63 = vpack.c.bf16 %v849_v61, %v849_v61  ;;  %v850_v41 = vmax.f32 %v804_v48, 0.0 }
 0x238   :  { %v1110_v0 = vpack.c.bf16 %v847_v62, %v847_v62  ;;  %v848_v35 = vmax.f32 %v796_v40, 0.0 }
 0x239   :  { %1010 = vst.msk [vmem:[%s1825_s5 + $0x68] sm:$0xf] %vm983_vm1, %v1112_v63  ;;  %v1113_v37 = vpack.c.bf16 %v850_v41, %v850_v41 }
 0x23a   :  { %1008 = vst.msk [vmem:[%s1825_s5 + $0x60] sm:$0xf] %vm983_vm1, %v1110_v0  ;;  %v1111_v50 = vpack.c.bf16 %v848_v35, %v848_v35  ;;  %v1279_v51 = vpop.f32.mrb[44].mxu1 }
 0x23b   :  { %1011 = vst.msk [vmem:[%s1825_s5 + $0x6c] sm:$0xf] %vm983_vm1, %v1113_v37  ;;  %v817_v1 = vadd.f32 %v1279_v51, %v1658_v54  ;;  %v808_v2 = vpop.f32.mrb[45].mxu1 }
 0x23c   :  { %1009 = vst.msk [vmem:[%s1825_s5 + $0x64] sm:$0xf] %vm983_vm1, %v1111_v50  ;;  %v809_v4 = vadd.f32 %v1658_v54, %v808_v2  ;;  %v1280_v5 = vpop.f32.mrb[46].mxu1 }
 0x23d   :  { %v853_v6 = vmax.f32 %v817_v1, 0.0  ;;  %v820_v9 = vadd.f32 %v1280_v5, %v1658_v54  ;;  %v811_v10 = vpop.f32.mrb[47].mxu1 }
 0x23e   :  { %v851_v52 = vmax.f32 %v809_v4, 0.0  ;;  %v812_v53 = vadd.f32 %v1658_v54, %v811_v10 }
 0x23f   :  { %v1116_v12 = vpack.c.bf16 %v853_v6, %v853_v6  ;;  %v854_v42 = vmax.f32 %v820_v9, 0.0 }
 0x240   :  { %v1114_v43 = vpack.c.bf16 %v851_v52, %v851_v52  ;;  %v852_v13 = vmax.f32 %v812_v53, 0.0 }
 0x241   :  { %1014 = vst.msk [vmem:[%s1825_s5 + $0x78] sm:$0xf] %vm983_vm1, %v1116_v12  ;;  %v1117_v55 = vpack.c.bf16 %v854_v42, %v854_v42 }
 0x242   :  { %1012 = vst.msk [vmem:[%s1825_s5 + $0x70] sm:$0xf] %vm983_vm1, %v1114_v43  ;;  %v1115_v56 = vpack.c.bf16 %v852_v13, %v852_v13 }
 0x243   :  { %1015 = vst.msk [vmem:[%s1825_s5 + $0x7c] sm:$0xf] %vm983_vm1, %v1117_v55 }
 0x244   :  { %1013 = vst.msk [vmem:[%s1825_s5 + $0x74] sm:$0xf] %vm983_vm1, %v1115_v56 }

// kernel: node_classifier_forward.3
= control target key start
LH: loop header
LB: loop body
LE: loop exit
PB: predicated region body
PF: predicated region fallthrough
CT: control target
= control target key end

     0   :  { %v2558_v1 = vmov 0   ;;  %vm639_vm0 = vcmask 261120   ;;  %s3260_s2 = inlined_call_operand.vmem [shape: bf16[256,32], index: 2, kind: input, shape index: {}, may-alias: {2,3}]   ;;  %s3261_s0 = inlined_call_operand.vmem [shape: s8[256,256], index: 0, kind: input, shape index: {}]   ;;  %s3262_s1 = inlined_call_operand.vmem [shape: f32[256,1], index: 1, kind: input, shape index: {}]   ;;  %s3263_s4 = inlined_call_operand.vmem [shape: bf16[32,32], index: 4, kind: input, shape index: {}]   ;;  %s3264_s7 = inlined_call_operand.vmem [shape: bf16[32,256], index: 7, kind: input, shape index: {}]   ;;  %s3265_s6 = inlined_call_operand.vmem [shape: bf16[32,256], index: 6, kind: input, shape index: {}]   ;;  %s3266_s5 = inlined_call_operand.vmem [shape: f32[1,32], index: 5, kind: input, shape index: {}]   ;;  %s3267_s3 = inlined_call_operand.vmem [shape: bf16[256,32], index: 3, kind: input, shape index: {}, may-alias: {2,3}]   ;;  %s3268_s9 = inlined_call_operand.vmem [shape: bf16[256,128], index: 9, kind: input, shape index: {}]   ;;  %s3269_s8 = inlined_call_operand.vmem [shape: f32[1,256], index: 8, kind: input, shape index: {}]   ;;  %s3270_s10 = inlined_call_operand.vmem [shape: f32[1,128], index: 10, kind: input, shape index: {}]   ;;  %s3271_s11 = inlined_call_operand.vmem [shape: f32[256,128], index: 11, kind: output, shape index: {}]  }
   0x1   :  { %v2496_v0 = vld [vmem:[%s3260_s2 + $0x40] sm:$0xff]   ;;  %2494 = vset.pattern.permute.xlu0 %v2558_v1  ;;  %2495 = vset.pattern.permute.xlu1 %v2558_v1  ;;  %v2498_v3 = vld [vmem:[%s3260_s2 + $0x48] sm:$0xff]   ;;  %v2500_v5 = vld [vmem:[%s3260_s2 + $0x50] sm:$0xff]  }
   0x2   :  { %v2497_v2 = vld [vmem:[%s3260_s2] sm:$0xff]   ;;  %2151 = vmatprep.subr.bf16.mxu0 %v2496_v0  ;;  %v2499_v4 = vld [vmem:[%s3260_s2 + $0x8] sm:$0xff]   ;;  %v2501_v6 = vld [vmem:[%s3260_s2 + $0x10] sm:$0xff]  }
   0x3   :  { %2152 = vmatpush3.bf16.msra.mxu0 %v2497_v2  ;;  %v2502_v7 = vld [vmem:[%s3260_s2 + $0x58] sm:$0xff]   ;;  %v2504_v9 = vld [vmem:[%s3260_s2 + $0x60] sm:$0xff]   ;;  %v2506_v11 = vld [vmem:[%s3260_s2 + $0x68] sm:$0xff]  }
   0x4   :  { %2153 = vmatprep.subr.bf16.mxu0 %v2498_v3  ;;  %v2503_v8 = vld [vmem:[%s3260_s2 + $0x18] sm:$0xff]   ;;  %v2505_v10 = vld [vmem:[%s3260_s2 + $0x20] sm:$0xff]   ;;  %v40_v12 = vld [vmem:[%s3261_s0 + $0x8] sm:$0xff] }
   0x5   :  { %v56_v13 = vunpack.c.l.s8.bf16 %v40_v12  ;;  %v376_v14 = vld [vmem:[%s3262_s1] sm:$0xff]  ;;  %v378_v15 = vld [vmem:[%s3262_s1 + $0x10] sm:$0xff]  ;;  %v2507_v16 = vld [vmem:[%s3260_s2 + $0x28] sm:$0xff]   ;;  %v58_v29 = vunpack.c.h.s8.bf16 %v40_v12 }
   0x6   :  { %410 = vperm.xlu0 %2494, %v376_v14   ;;  %v377_v17 = vld [vmem:[%s3262_s1 + $0x8] sm:$0xff]  ;;  %v2508_v18 = vld [vmem:[%s3260_s2 + $0x70] sm:$0xff]   ;;  %420 = vperm.xlu1 %2495, %v378_v15   ;;  %v379_v19 = vld [vmem:[%s3262_s1 + $0x18] sm:$0xff] }
   0x7   :  { %2154 = vmatpush3.bf16.msra.mxu0 %v2499_v4  ;;  %247 = vmatprep.mubr.bf16.mxu0 %v56_v13  ;;  %v2509_v20 = vld [vmem:[%s3260_s2 + $0x30] sm:$0xff]   ;;  %v380_v21 = vld [vmem:[%s3262_s1 + $0x20] sm:$0xff]  ;;  %v2510_v22 = vld [vmem:[%s3260_s2 + $0x78] sm:$0xff]  }
   0x8   :  { %2155 = vmatprep.subr.bf16.mxu0 %v2500_v5  ;;  %v381_v23 = vld [vmem:[%s3262_s1 + $0x28] sm:$0xff]  ;;  %v2511_v24 = vld [vmem:[%s3260_s2 + $0x38] sm:$0xff]   ;;  %v39_v25 = vld [vmem:[%s3261_s0] sm:$0xff] }
   0x9   :  { %v382_v26 = vld [vmem:[%s3262_s1 + $0x30] sm:$0xff]  ;;  %v383_v27 = vld [vmem:[%s3262_s1 + $0x38] sm:$0xff]  ;;  %v55_v28 = vunpack.c.l.s8.bf16 %v39_v25  ;;  %v384_v30 = vld [vmem:[%s3262_s1 + $0x40] sm:$0xff]  ;;  %v57_v35 = vunpack.c.h.s8.bf16 %v39_v25 }
   0xa   :  { %415 = vperm.xlu0 %2494, %v377_v17   ;;  %425 = vperm.xlu1 %2495, %v379_v19   ;;  %v385_v31 = vld [vmem:[%s3262_s1 + $0x48] sm:$0xff]  ;;  %v386_v32 = vld [vmem:[%s3262_s1 + $0x50] sm:$0xff]  ;;  %v42_v33 = vld [vmem:[%s3261_s0 + $0x18] sm:$0xff] }
   0xb   :  { %2156 = vmatpush3.bf16.msra.mxu0 %v2501_v6  ;;  %v387_v34 = vld [vmem:[%s3262_s1 + $0x58] sm:$0xff]  ;;  %v60_v36 = vunpack.c.l.s8.bf16 %v42_v33  ;;  %v388_v37 = vld [vmem:[%s3262_s1 + $0x60] sm:$0xff]  ;;  %v389_v38 = vld [vmem:[%s3262_s1 + $0x68] sm:$0xff]  ;;  %v62_v43 = vunpack.c.h.s8.bf16 %v42_v33 }
   0xc   :  { %2157 = vmatprep.subr.bf16.mxu0 %v2502_v7  ;;  %v41_v39 = vld [vmem:[%s3261_s0 + $0x10] sm:$0xff]  ;;  %v391_v41 = vld [vmem:[%s3262_s1 + $0x78] sm:$0xff]  ;;  %v392_v44 = vld [vmem:[%s3262_s1 + $0x80] sm:$0xff] }
   0xd   :  { %v390_v40 = vld [vmem:[%s3262_s1 + $0x70] sm:$0xff]  ;;  %v59_v42 = vunpack.c.l.s8.bf16 %v41_v39  ;;  %v393_v45 = vld [vmem:[%s3262_s1 + $0x88] sm:$0xff]  ;;  %v395_v48 = vld [vmem:[%s3262_s1 + $0x98] sm:$0xff]  ;;  %v61_v49 = vunpack.c.h.s8.bf16 %v41_v39 }
   0xe   :  { %430 = vperm.xlu0 %2494, %v380_v21   ;;  %435 = vperm.xlu1 %2495, %v381_v23   ;;  %v394_v46 = vld [vmem:[%s3262_s1 + $0x90] sm:$0xff]  ;;  %v44_v47 = vld [vmem:[%s3261_s0 + $0x28] sm:$0xff]  ;;  %v396_v51 = vld [vmem:[%s3262_s1 + $0xa0] sm:$0xff] }
   0xf   :  { %2158 = vmatpush3.bf16.msra.mxu0 %v2503_v8  ;;  %v64_v50 = vunpack.c.l.s8.bf16 %v44_v47  ;;  %v397_v52 = vld [vmem:[%s3262_s1 + $0xa8] sm:$0xff]  ;;  %v43_v53 = vld [vmem:[%s3261_s0 + $0x20] sm:$0xff]  ;;  %v398_v54 = vld [vmem:[%s3262_s1 + $0xb0] sm:$0xff]  ;;  %v66_v57 = vunpack.c.h.s8.bf16 %v44_v47 }
  0x10   :  { %2159 = vmatprep.subr.bf16.mxu0 %v2504_v9  ;;  %v399_v55 = vld [vmem:[%s3262_s1 + $0xb8] sm:$0xff]  ;;  %v63_v56 = vunpack.c.l.s8.bf16 %v43_v53  ;;  %v400_v58 = vld [vmem:[%s3262_s1 + $0xc0] sm:$0xff]  ;;  %v401_v59 = vld [vmem:[%s3262_s1 + $0xc8] sm:$0xff]  ;;  %v65_v63 = vunpack.c.h.s8.bf16 %v43_v53 }
  0x11   :  { %v402_v60 = vld [vmem:[%s3262_s1 + $0xd0] sm:$0xff]  ;;  %v46_v61 = vld [vmem:[%s3261_s0 + $0x38] sm:$0xff]  ;;  %v404_v2 = vld [vmem:[%s3262_s1 + $0xe0] sm:$0xff] }
  0x12   :  { %440 = vperm.xlu0 %2494, %v382_v26   ;;  %445 = vperm.xlu1 %2495, %v383_v27   ;;  %v403_v62 = vld [vmem:[%s3262_s1 + $0xd8] sm:$0xff]  ;;  %v68_v0 = vunpack.c.l.s8.bf16 %v46_v61  ;;  %v405_v3 = vld [vmem:[%s3262_s1 + $0xe8] sm:$0xff]  ;;  %v45_v4 = vld [vmem:[%s3261_s0 + $0x30] sm:$0xff]  ;;  %v70_v8 = vunpack.c.h.s8.bf16 %v46_v61 }
  0x13   :  { %2160 = vmatpush3.bf16.msra.mxu0 %v2505_v10  ;;  %v406_v5 = vld [vmem:[%s3262_s1 + $0xf0] sm:$0xff]  ;;  %v407_v6 = vld [vmem:[%s3262_s1 + $0xf8] sm:$0xff]  ;;  %v67_v7 = vunpack.c.l.s8.bf16 %v45_v4  ;;  %v48_v9 = vld [vmem:[%s3261_s0 + $0x48] sm:$0xff]  ;;  %v69_v10 = vunpack.c.h.s8.bf16 %v45_v4 }
  0x14   :  { %2161 = vmatprep.subr.bf16.mxu0 %v2506_v11  ;;  %v72_v11 = vunpack.c.l.s8.bf16 %v48_v9  ;;  %v47_v12 = vld [vmem:[%s3261_s0 + $0x40] sm:$0xff]  ;;  %v74_v14 = vunpack.c.h.s8.bf16 %v48_v9  ;;  %v50_v15 = vld [vmem:[%s3261_s0 + $0x58] sm:$0xff]  ;;  %v52_v21 = vld [vmem:[%s3261_s0 + $0x68] sm:$0xff] }
  0x15   :  { %v71_v13 = vunpack.c.l.s8.bf16 %v47_v12  ;;  %v76_v17 = vunpack.c.l.s8.bf16 %v50_v15  ;;  %v80_v23 = vunpack.c.l.s8.bf16 %v52_v21  ;;  %v2512_v25 = vld [vmem:[%s3263_s4] sm:$0xff]   ;;  %v82_v27 = vunpack.c.h.s8.bf16 %v52_v21  ;;  %v2519_v61 = vld [vmem:[%s3264_s7 + $0x14] ss:$8 sps:$4 sm:$0xff]  }
  0x16   :  { %450 = vperm.xlu0 %2494, %v384_v30   ;;  %455 = vperm.xlu1 %2495, %v385_v31  }
  0x17   :  { %2162 = vmatpush3.bf16.msra.mxu0 %v2507_v16  ;;  %v73_v16 = vunpack.c.h.s8.bf16 %v47_v12  ;;  %2393 = vmatprep.subr.bf16.mxu1 %v2512_v25 }
  0x18   :  { %2163 = vmatprep.subr.bf16.mxu0 %v2508_v18  ;;  %v49_v18 = vld [vmem:[%s3261_s0 + $0x50] sm:$0xff]  ;;  %2394 = vmatpush3.bf16.msra.mxu1 %v2512_v25 }
  0x19   :  { %v75_v19 = vunpack.c.l.s8.bf16 %v49_v18 }
  0x1a   :  { %460 = vperm.xlu0 %2494, %v386_v32   ;;  %465 = vperm.xlu1 %2495, %v387_v34   ;;  %v53_v32 = vld [vmem:[%s3261_s0 + $0x70] sm:$0xff] }
  0x1b   :  { %2164 = vmatpush3.bf16.msra.mxu0 %v2509_v20  ;;  %v78_v20 = vunpack.c.h.s8.bf16 %v50_v15  ;;  %v83_v33 = vunpack.c.l.s8.bf16 %v53_v32 }
  0x1c   :  { %2165 = vmatprep.subr.bf16.mxu0 %v2510_v22  ;;  %v77_v22 = vunpack.c.h.s8.bf16 %v49_v18 }
  0x1e   :  { %470 = vperm.xlu0 %2494, %v388_v37   ;;  %475 = vperm.xlu1 %2495, %v389_v38  }
  0x1f   :  { %2166 = vmatpush3.bf16.msra.mxu0 %v2511_v24  ;;  %v51_v24 = vld [vmem:[%s3261_s0 + $0x60] sm:$0xff] }
  0x20   :  { %v79_v26 = vunpack.c.l.s8.bf16 %v51_v24  ;;  %v81_v30 = vunpack.c.h.s8.bf16 %v51_v24 }
  0x22   :  { %248 = vmatmul.mubr.bf16.vlgmr.msra.gmra.mrb[0].mxu0 %v55_v28  ;;  %480 = vperm.xlu0 %2494, %v390_v40   ;;  %v2513_v28 = vld [vmem:[%s3263_s4 + $0x8] sm:$0xff]  }
  0x23   :  { %255 = vmatprep.mubr.bf16.mxu0 %v58_v29  ;;  %485 = vperm.xlu1 %2495, %v391_v41   ;;  %v54_v29 = vld [vmem:[%s3261_s0 + $0x78] sm:$0xff] }
  0x24   :  { %2395 = vmatprep.subr.bf16.mxu1 %v2513_v28  ;;  %v84_v31 = vunpack.c.l.s8.bf16 %v54_v29  ;;  %v86_v34 = vunpack.c.h.s8.bf16 %v54_v29 }
  0x25   :  { %2396 = vmatpush3.bf16.msra.mxu1 %v2513_v28 }
  0x26   :  { %490 = vperm.xlu0 %2494, %v392_v44  }
  0x27   :  { %495 = vperm.xlu1 %2495, %v393_v45  }
  0x2a   :  { %256 = vmatmul.mubr.bf16.gmra.mrb[4].mxu0 %v57_v35  ;;  %500 = vperm.xlu0 %2494, %v394_v46   ;;  %v85_v35 = vunpack.c.h.s8.bf16 %v53_v32 }
  0x2b   :  { %263 = vmatprep.mubr.bf16.mxu0 %v60_v36  ;;  %505 = vperm.xlu1 %2495, %v395_v48  }
  0x2e   :  { %510 = vperm.xlu0 %2494, %v396_v51  }
  0x2f   :  { %515 = vperm.xlu1 %2495, %v397_v52  }
  0x32   :  { %264 = vmatmul.mubr.bf16.gmra.mrb[8].mxu0 %v59_v42  ;;  %520 = vperm.xlu0 %2494, %v398_v54  }
  0x33   :  { %271 = vmatprep.mubr.bf16.mxu0 %v62_v43  ;;  %525 = vperm.xlu1 %2495, %v399_v55   ;;  %v2516_v43 = vld [vmem:[%s3264_s7 + $0x4] ss:$8 sps:$4 sm:$0xff]  }
  0x34   :  { %1005 = vmatprep.subr.bf16.mxu1 %v2516_v43 }
  0x36   :  { %530 = vperm.xlu0 %2494, %v400_v58   ;;  %v2514_v58 = vld [vmem:[%s3264_s7] ss:$8 sps:$4 sm:$0xff]  }
  0x37   :  { %535 = vperm.xlu1 %2495, %v401_v59  }
  0x3a   :  { %272 = vmatmul.mubr.bf16.gmra.mrb[12].mxu0 %v61_v49  ;;  %540 = vperm.xlu0 %2494, %v402_v60  }
  0x3b   :  { %279 = vmatprep.mubr.bf16.mxu0 %v64_v50  ;;  %545 = vperm.xlu1 %2495, %v403_v62  }
  0x3e   :  { %550 = vperm.xlu0 %2494, %v404_v2  }
  0x3f   :  { %555 = vperm.xlu1 %2495, %v405_v3   ;;  %v2517_v3 = vld [vmem:[%s3264_s7 + $0x10] ss:$8 sps:$4 sm:$0xff]  }
  0x42   :  { %280 = vmatmul.mubr.bf16.gmra.mrb[16].mxu0 %v63_v56  ;;  %560 = vperm.xlu0 %2494, %v406_v5  }
  0x43   :  { %287 = vmatprep.mubr.bf16.mxu0 %v66_v57  ;;  %565 = vperm.xlu1 %2495, %v407_v6  }
  0x4a   :  { %288 = vmatmul.mubr.bf16.gmra.mrb[20].mxu0 %v65_v63 }
  0x4b   :  { %295 = vmatprep.mubr.bf16.mxu0 %v68_v0 }
  0x52   :  { %296 = vmatmul.mubr.bf16.gmra.mrb[24].mxu0 %v67_v7 }
  0x53   :  { %303 = vmatprep.mubr.bf16.mxu0 %v70_v8 }
  0x5a   :  { %304 = vmatmul.mubr.bf16.gmra.mrb[28].mxu0 %v69_v10 }
  0x5b   :  { %311 = vmatprep.mubr.bf16.mxu0 %v72_v11 }
  0x62   :  { %312 = vmatmul.mubr.bf16.gmra.mrb[32].mxu0 %v71_v13 }
  0x63   :  { %319 = vmatprep.mubr.bf16.mxu0 %v74_v14 }
  0x6a   :  { %320 = vmatmul.mubr.bf16.gmra.mrb[36].mxu0 %v73_v16 }
  0x6b   :  { %327 = vmatprep.mubr.bf16.mxu0 %v76_v17 }
  0x72   :  { %328 = vmatmul.mubr.bf16.gmra.mrb[40].mxu0 %v75_v19 }
  0x73   :  { %335 = vmatprep.mubr.bf16.mxu0 %v78_v20 }
  0x7a   :  { %336 = vmatmul.mubr.bf16.gmra.mrb[44].mxu0 %v77_v22 }
  0x7b   :  { %343 = vmatprep.mubr.bf16.mxu0 %v80_v23 }
  0x82   :  { %344 = vmatmul.mubr.bf16.gmra.mrb[48].mxu0 %v79_v26 }
  0x83   :  { %351 = vmatprep.mubr.bf16.mxu0 %v82_v27 }
  0x85   :  { %v411_v36 = vpop.permute.xlu0 %410  ;;  %v421_v47 = vpop.permute.xlu1 %420 }
  0x89   :  { %v416_v44 = vpop.permute.xlu0 %415  ;;  %v426_v55 = vpop.permute.xlu1 %425 }
  0x8a   :  { %352 = vmatmul.mubr.bf16.gmra.mrb[52].mxu0 %v81_v30 }
  0x8b   :  { %359 = vmatprep.mubr.bf16.mxu0 %v84_v31 }
  0x8d   :  { %v431_v5 = vpop.permute.xlu0 %430  ;;  %v436_v6 = vpop.permute.xlu1 %435 }
  0x91   :  { %v441_v16 = vpop.permute.xlu0 %440  ;;  %v446_v17 = vpop.permute.xlu1 %445 }
  0x92   :  { %360 = vmatmul.mubr.bf16.gmra.mrb[56].mxu0 %v83_v33 }
  0x93   :  { %367 = vmatprep.mubr.bf16.mxu0 %v86_v34 }
  0x95   :  { %v451_v27 = vpop.permute.xlu0 %450  ;;  %v456_v28 = vpop.permute.xlu1 %455 }
  0x9a   :  { %368 = vmatmul.mubr.bf16.gmra.mrb[60].mxu0 %v85_v35 }
  0xf5   :  { %v2167_v37 = vpop.f32.mrb[0].mxu0 }
  0xf6   :  { %v2168_v38 = vpop.f32.mrb[1].mxu0 }
  0xf7   :  { %v2169_v39 = vadd.f32 %v2168_v38, %v2167_v37  ;;  %v2170_v40 = vpop.f32.mrb[2].mxu0  ;;  %v461_v38 = vpop.permute.xlu0 %460 }
  0xf8   :  { %v2171_v41 = vpop.f32.mrb[3].mxu0 }
  0xf9   :  { %v2172_v42 = vadd.f32 %v2171_v41, %v2170_v40  ;;  %v568_v45 = vmul.f32 %v2169_v39, %v411_v36  ;;  %v466_v39 = vpop.permute.xlu1 %465 }
  0xfb   :  { %v569_v46 = vmul.f32 %v2172_v42, %v416_v44 }
  0xfd   :  { %v2173_v48 = vpop.f32.mrb[4].mxu0  ;;  %v600_v49 = vpack.c.bf16 %v569_v46, %v568_v45 }
  0xfe   :  { %v2174_v50 = vpop.f32.mrb[5].mxu0 }
  0xff   :  { %v2175_v51 = vadd.f32 %v2174_v50, %v2173_v48  ;;  %v2176_v52 = vpop.f32.mrb[6].mxu0  ;;  %2397 = vmatprep.mubr.msk.bf16.mxu1 %vm639_vm0, %v600_v49  ;;  %v471_v49 = vpop.permute.xlu0 %470 }
 0x100   :  { %v2177_v53 = vpop.f32.mrb[7].mxu0  ;;  %v476_v50 = vpop.permute.xlu1 %475 }
 0x101   :  { %v2178_v54 = vadd.f32 %v2177_v53, %v2176_v52  ;;  %v570_v56 = vmul.f32 %v2175_v51, %v421_v47 }
 0x103   :  { %v571_v57 = vmul.f32 %v2178_v54, %v426_v55 }
 0x105   :  { %v601_v59 = vpack.c.bf16 %v571_v57, %v570_v56  ;;  %v2179_v60 = vpop.f32.mrb[8].mxu0 }
 0x106   :  { %v2180_v62 = vpop.f32.mrb[9].mxu0 }
 0x107   :  { %v2181_v63 = vadd.f32 %v2180_v62, %v2179_v60  ;;  %v2182_v0 = vpop.f32.mrb[10].mxu0  ;;  %2398 = vmatmul.mubr.msk.bf16.vlgmr.msra.gmra.mrb[0].mxu1 %vm639_vm0, %v601_v59  ;;  %v481_v60 = vpop.permute.xlu0 %480 }
 0x108   :  { %v2183_v2 = vpop.f32.mrb[11].mxu0  ;;  %1006 = vmatpush1.bf16.msra.mxu1 %v2514_v58 }
 0x109   :  { %v2184_v4 = vadd.f32 %v2183_v2, %v2182_v0  ;;  %1007 = vmatprep.subr.bf16.mxu1 %v2519_v61  ;;  %v572_v7 = vmul.f32 %v2181_v63, %v431_v5  ;;  %v486_v61 = vpop.permute.xlu1 %485 }
 0x10b   :  { %v573_v8 = vmul.f32 %v2184_v4, %v436_v6 }
 0x10c   :  { %1008 = vmatpush1.bf16.msra.mxu1 %v2517_v3 }
 0x10d   :  { %v602_v9 = vpack.c.bf16 %v573_v8, %v572_v7  ;;  %v2185_v10 = vpop.f32.mrb[12].mxu0  ;;  %v491_v8 = vpop.permute.xlu0 %490 }
 0x10e   :  { %v2186_v11 = vpop.f32.mrb[13].mxu0 }
 0x10f   :  { %v2187_v12 = vadd.f32 %v2186_v11, %v2185_v10  ;;  %v2188_v13 = vpop.f32.mrb[14].mxu0  ;;  %2401 = vmatprep.mubr.msk.bf16.mxu1 %vm639_vm0, %v602_v9  ;;  %v496_v9 = vpop.permute.xlu1 %495 }
 0x110   :  { %v2189_v14 = vpop.f32.mrb[15].mxu0 }
 0x111   :  { %v2190_v15 = vadd.f32 %v2189_v14, %v2188_v13  ;;  %v574_v18 = vmul.f32 %v2187_v12, %v441_v16 }
 0x113   :  { %v575_v19 = vmul.f32 %v2190_v15, %v446_v17 }
 0x115   :  { %v603_v20 = vpack.c.bf16 %v575_v19, %v574_v18  ;;  %v2191_v21 = vpop.f32.mrb[16].mxu0  ;;  %v501_v19 = vpop.permute.xlu0 %500 }
 0x116   :  { %v2192_v22 = vpop.f32.mrb[17].mxu0 }
 0x117   :  { %v2193_v23 = vadd.f32 %v2192_v22, %v2191_v21  ;;  %v2194_v24 = vpop.f32.mrb[18].mxu0  ;;  %2402 = vmatmul.mubr.msk.bf16.gmra.mrb[4].mxu1 %vm639_vm0, %v603_v20  ;;  %v506_v20 = vpop.permute.xlu1 %505 }
 0x118   :  { %v2195_v25 = vpop.f32.mrb[19].mxu0 }
 0x119   :  { %v2196_v26 = vadd.f32 %v2195_v25, %v2194_v24  ;;  %v576_v29 = vmul.f32 %v2193_v23, %v451_v27 }
 0x11b   :  { %v577_v30 = vmul.f32 %v2196_v26, %v456_v28 }
 0x11d   :  { %v604_v31 = vpack.c.bf16 %v577_v30, %v576_v29  ;;  %v2197_v32 = vpop.f32.mrb[20].mxu0  ;;  %v511_v30 = vpop.permute.xlu0 %510 }
 0x11e   :  { %v2198_v33 = vpop.f32.mrb[21].mxu0 }
 0x11f   :  { %v2199_v34 = vadd.f32 %v2198_v33, %v2197_v32  ;;  %v2200_v35 = vpop.f32.mrb[22].mxu0  ;;  %2405 = vmatprep.mubr.msk.bf16.mxu1 %vm639_vm0, %v604_v31  ;;  %v516_v31 = vpop.permute.xlu1 %515 }
 0x120   :  { %v2201_v36 = vpop.f32.mrb[23].mxu0 }
 0x121   :  { %v2202_v37 = vadd.f32 %v2201_v36, %v2200_v35  ;;  %v578_v40 = vmul.f32 %v2199_v34, %v461_v38 }
 0x123   :  { %v579_v41 = vmul.f32 %v2202_v37, %v466_v39 }
 0x125   :  { %v605_v42 = vpack.c.bf16 %v579_v41, %v578_v40  ;;  %v2203_v43 = vpop.f32.mrb[24].mxu0  ;;  %v521_v41 = vpop.permute.xlu0 %520 }
 0x126   :  { %v2204_v44 = vpop.f32.mrb[25].mxu0 }
 0x127   :  { %v2205_v45 = vadd.f32 %v2204_v44, %v2203_v43  ;;  %v2206_v46 = vpop.f32.mrb[26].mxu0  ;;  %2406 = vmatmul.mubr.msk.bf16.gmra.mrb[8].mxu1 %vm639_vm0, %v605_v42  ;;  %v526_v42 = vpop.permute.xlu1 %525 }
 0x128   :  { %v2207_v47 = vpop.f32.mrb[27].mxu0 }
 0x129   :  { %v2208_v48 = vadd.f32 %v2207_v47, %v2206_v46  ;;  %v580_v51 = vmul.f32 %v2205_v45, %v471_v49 }
 0x12b   :  { %v581_v52 = vmul.f32 %v2208_v48, %v476_v50 }
 0x12d   :  { %v606_v53 = vpack.c.bf16 %v581_v52, %v580_v51  ;;  %v2209_v54 = vpop.f32.mrb[28].mxu0  ;;  %v531_v52 = vpop.permute.xlu0 %530 }
 0x12e   :  { %v2210_v55 = vpop.f32.mrb[29].mxu0 }
 0x12f   :  { %v2211_v56 = vadd.f32 %v2210_v55, %v2209_v54  ;;  %v2212_v57 = vpop.f32.mrb[30].mxu0  ;;  %2409 = vmatprep.mubr.msk.bf16.mxu1 %vm639_vm0, %v606_v53  ;;  %v536_v53 = vpop.permute.xlu1 %535 }
 0x130   :  { %v2213_v58 = vpop.f32.mrb[31].mxu0 }
 0x131   :  { %v2214_v59 = vadd.f32 %v2213_v58, %v2212_v57  ;;  %v582_v62 = vmul.f32 %v2211_v56, %v481_v60 }
 0x133   :  { %v583_v63 = vmul.f32 %v2214_v59, %v486_v61 }
 0x135   :  { %v607_v0 = vpack.c.bf16 %v583_v63, %v582_v62  ;;  %v2215_v2 = vpop.f32.mrb[32].mxu0  ;;  %v541_v63 = vpop.permute.xlu0 %540 }
 0x136   :  { %v2216_v3 = vpop.f32.mrb[33].mxu0 }
 0x137   :  { %v2217_v4 = vadd.f32 %v2216_v3, %v2215_v2  ;;  %v2218_v5 = vpop.f32.mrb[34].mxu0  ;;  %2410 = vmatmul.mubr.msk.bf16.gmra.mrb[12].mxu1 %vm639_vm0, %v607_v0  ;;  %v546_v0 = vpop.permute.xlu1 %545 }
 0x138   :  { %v2219_v6 = vpop.f32.mrb[35].mxu0 }
 0x139   :  { %v2220_v7 = vadd.f32 %v2219_v6, %v2218_v5  ;;  %v584_v10 = vmul.f32 %v2217_v4, %v491_v8  ;;  %v2522_v4 = vld [vmem:[%s3265_s6 + $0x4] ss:$8 sps:$4 sm:$0xff]  }
 0x13a   :  { %1346 = vmatprep.subr.bf16.mxu1 %v2522_v4 }
 0x13b   :  { %v585_v11 = vmul.f32 %v2220_v7, %v496_v9 }
 0x13d   :  { %v608_v12 = vpack.c.bf16 %v585_v11, %v584_v10  ;;  %v2221_v13 = vpop.f32.mrb[36].mxu0 }
 0x13e   :  { %v2222_v14 = vpop.f32.mrb[37].mxu0 }
 0x13f   :  { %v2223_v15 = vadd.f32 %v2222_v14, %v2221_v13  ;;  %v2224_v16 = vpop.f32.mrb[38].mxu0  ;;  %2413 = vmatprep.mubr.msk.bf16.mxu1 %vm639_vm0, %v608_v12  ;;  %v551_v12 = vpop.permute.xlu0 %550 }
 0x140   :  { %v2225_v17 = vpop.f32.mrb[39].mxu0  ;;  %v556_v13 = vpop.permute.xlu1 %555 }
 0x141   :  { %v2226_v18 = vadd.f32 %v2225_v17, %v2224_v16  ;;  %v586_v21 = vmul.f32 %v2223_v15, %v501_v19 }
 0x143   :  { %v587_v22 = vmul.f32 %v2226_v18, %v506_v20 }
 0x145   :  { %v609_v23 = vpack.c.bf16 %v587_v22, %v586_v21  ;;  %v2227_v24 = vpop.f32.mrb[40].mxu0 }
 0x146   :  { %v2228_v25 = vpop.f32.mrb[41].mxu0 }
 0x147   :  { %v2229_v26 = vadd.f32 %v2228_v25, %v2227_v24  ;;  %v2230_v27 = vpop.f32.mrb[42].mxu0  ;;  %2414 = vmatmul.mubr.msk.bf16.gmra.mrb[16].mxu1 %vm639_vm0, %v609_v23  ;;  %v561_v23 = vpop.permute.xlu0 %560 }
 0x148   :  { %v2231_v28 = vpop.f32.mrb[43].mxu0  ;;  %v566_v24 = vpop.permute.xlu1 %565 }
 0x149   :  { %v2232_v29 = vadd.f32 %v2231_v28, %v2230_v27  ;;  %v588_v32 = vmul.f32 %v2229_v26, %v511_v30  ;;  %v2854_v28 = vld [vmem:[%s3266_s5] ss:$0 sm:$0xff] }
 0x14b   :  { %v589_v33 = vmul.f32 %v2232_v29, %v516_v31 }
 0x14d   :  { %v610_v34 = vpack.c.bf16 %v589_v33, %v588_v32  ;;  %v2233_v35 = vpop.f32.mrb[44].mxu0 }
 0x14e   :  { %v2234_v36 = vpop.f32.mrb[45].mxu0 }
 0x14f   :  { %v2235_v37 = vadd.f32 %v2234_v36, %v2233_v35  ;;  %v2236_v38 = vpop.f32.mrb[46].mxu0  ;;  %2417 = vmatprep.mubr.msk.bf16.mxu1 %vm639_vm0, %v610_v34 }
 0x150   :  { %v2237_v39 = vpop.f32.mrb[47].mxu0 }
 0x151   :  { %v2238_v40 = vadd.f32 %v2237_v39, %v2236_v38  ;;  %v590_v43 = vmul.f32 %v2235_v37, %v521_v41  ;;  %v2520_v39 = vld [vmem:[%s3265_s6] ss:$8 sps:$4 sm:$0xff]  }
 0x153   :  { %v591_v44 = vmul.f32 %v2238_v40, %v526_v42  ;;  %v2525_v42 = vld [vmem:[%s3265_s6 + $0x14] ss:$8 sps:$4 sm:$0xff]  }
 0x155   :  { %v611_v45 = vpack.c.bf16 %v591_v44, %v590_v43  ;;  %v2239_v46 = vpop.f32.mrb[48].mxu0 }
 0x156   :  { %v2240_v47 = vpop.f32.mrb[49].mxu0 }
 0x157   :  { %v2241_v48 = vadd.f32 %v2240_v47, %v2239_v46  ;;  %v2242_v49 = vpop.f32.mrb[50].mxu0  ;;  %2418 = vmatmul.mubr.msk.bf16.gmra.mrb[20].mxu1 %vm639_vm0, %v611_v45  ;;  %v2523_v45 = vld [vmem:[%s3265_s6 + $0x10] ss:$8 sps:$4 sm:$0xff]  }
 0x158   :  { %v2243_v50 = vpop.f32.mrb[51].mxu0 }
 0x159   :  { %v2244_v51 = vadd.f32 %v2243_v50, %v2242_v49  ;;  %v592_v54 = vmul.f32 %v2241_v48, %v531_v52 }
 0x15b   :  { %v593_v55 = vmul.f32 %v2244_v51, %v536_v53 }
 0x15d   :  { %v612_v56 = vpack.c.bf16 %v593_v55, %v592_v54  ;;  %v2245_v57 = vpop.f32.mrb[52].mxu0 }
 0x15e   :  { %v2246_v58 = vpop.f32.mrb[53].mxu0 }
 0x15f   :  { %v2247_v59 = vadd.f32 %v2246_v58, %v2245_v57  ;;  %v2248_v60 = vpop.f32.mrb[54].mxu0  ;;  %2421 = vmatprep.mubr.msk.bf16.mxu1 %vm639_vm0, %v612_v56 }
 0x160   :  { %v2249_v61 = vpop.f32.mrb[55].mxu0 }
 0x161   :  { %v2250_v62 = vadd.f32 %v2249_v61, %v2248_v60  ;;  %v594_v2 = vmul.f32 %v2247_v59, %v541_v63 }
 0x163   :  { %v595_v3 = vmul.f32 %v2250_v62, %v546_v0 }
 0x165   :  { %v613_v5 = vpack.c.bf16 %v595_v3, %v594_v2  ;;  %v2251_v6 = vpop.f32.mrb[56].mxu0 }
 0x166   :  { %v2252_v7 = vpop.f32.mrb[57].mxu0 }
 0x167   :  { %v2253_v8 = vadd.f32 %v2252_v7, %v2251_v6  ;;  %v2254_v9 = vpop.f32.mrb[58].mxu0  ;;  %2422 = vmatmul.mubr.msk.bf16.gmra.mrb[24].mxu1 %vm639_vm0, %v613_v5 }
 0x168   :  { %v2255_v10 = vpop.f32.mrb[59].mxu0 }
 0x169   :  { %v2256_v11 = vadd.f32 %v2255_v10, %v2254_v9  ;;  %v596_v14 = vmul.f32 %v2253_v8, %v551_v12 }
 0x16b   :  { %v597_v15 = vmul.f32 %v2256_v11, %v556_v13 }
 0x16d   :  { %v614_v16 = vpack.c.bf16 %v597_v15, %v596_v14  ;;  %v2257_v17 = vpop.f32.mrb[60].mxu0 }
 0x16e   :  { %v2258_v18 = vpop.f32.mrb[61].mxu0 }
 0x16f   :  { %v2259_v19 = vadd.f32 %v2258_v18, %v2257_v17  ;;  %v2260_v20 = vpop.f32.mrb[62].mxu0  ;;  %2425 = vmatprep.mubr.msk.bf16.mxu1 %vm639_vm0, %v614_v16 }
 0x170   :  { %v2261_v21 = vpop.f32.mrb[63].mxu0 }
 0x171   :  { %v2262_v22 = vadd.f32 %v2261_v21, %v2260_v20  ;;  %v598_v25 = vmul.f32 %v2259_v19, %v561_v23 }
 0x173   :  { %v599_v26 = vmul.f32 %v2262_v22, %v566_v24 }
 0x175   :  { %v615_v27 = vpack.c.bf16 %v599_v26, %v598_v25 }
 0x177   :  { %2426 = vmatmul.mubr.msk.bf16.gmra.mrb[28].mxu1 %vm639_vm0, %v615_v27 }
 0x178   :  { %1037 = vmatprep.mubr.bf16.mxu1 %v2558_v1 }
 0x1da   :  { %v2399_v29 = vpop.f32.mrb[0].mxu1 }
 0x1db   :  { %v731_v30 = vadd.f32 %v2399_v29, %v2854_v28  ;;  %v722_v31 = vpop.f32.mrb[1].mxu1 }
 0x1dc   :  { %v723_v32 = vadd.f32 %v2854_v28, %v722_v31  ;;  %v2400_v33 = vpop.f32.mrb[2].mxu1 }
 0x1dd   :  { %v734_v34 = vadd.f32 %v2400_v33, %v2854_v28  ;;  %v725_v35 = vpop.f32.mrb[3].mxu1  ;;  %v851_v37 = vmax.f32 %v731_v30, 0.0 }
 0x1de   :  { %v726_v36 = vadd.f32 %v2854_v28, %v725_v35  ;;  %v849_v40 = vmax.f32 %v723_v32, 0.0 }
 0x1df   :  { %v852_v38 = vmax.f32 %v734_v34, 0.0 }
 0x1e0   :  { %v850_v41 = vmax.f32 %v726_v36, 0.0 }
 0x1e1   :  { %v918_v43 = vpack.c.bf16 %v852_v38, %v851_v37 }
 0x1e2   :  { %v917_v44 = vpack.c.bf16 %v850_v41, %v849_v40 }
 0x1e4   :  { %2082 = vmatmul.mubr.msk.bf16.vlgmr.msra.gmra.mrb[32].mxu1 %vm639_vm0, %v917_v44 }
 0x1e5   :  { %1347 = vmatpush1.bf16.msra.mxu1 %v2520_v39  ;;  %1047 = vmatprep.mubr.bf16.mxu1 %v2558_v1 }
 0x1e6   :  { %1348 = vmatprep.subr.bf16.mxu1 %v2525_v42 }
 0x1e9   :  { %1349 = vmatpush1.bf16.msra.mxu1 %v2523_v45 }
 0x1ea   :  { %v2403_v46 = vpop.f32.mrb[4].mxu1 }
 0x1eb   :  { %v747_v47 = vadd.f32 %v2403_v46, %v2854_v28  ;;  %v738_v48 = vpop.f32.mrb[5].mxu1 }
 0x1ec   :  { %v739_v49 = vadd.f32 %v2854_v28, %v738_v48  ;;  %v2404_v50 = vpop.f32.mrb[6].mxu1  ;;  %2083 = vmatmul.mubr.msk.bf16.gmra.mrb[36].mxu1 %vm639_vm0, %v918_v43 }
 0x1ed   :  { %v750_v51 = vadd.f32 %v2404_v50, %v2854_v28  ;;  %v741_v52 = vpop.f32.mrb[7].mxu1  ;;  %1057 = vmatprep.mubr.bf16.mxu1 %v2558_v1  ;;  %v855_v54 = vmax.f32 %v747_v47, 0.0 }
 0x1ee   :  { %v742_v53 = vadd.f32 %v2854_v28, %v741_v52  ;;  %v853_v56 = vmax.f32 %v739_v49, 0.0 }
 0x1ef   :  { %v856_v55 = vmax.f32 %v750_v51, 0.0 }
 0x1f0   :  { %v854_v57 = vmax.f32 %v742_v53, 0.0 }
 0x1f1   :  { %v920_v58 = vpack.c.bf16 %v856_v55, %v855_v54 }
 0x1f2   :  { %v919_v59 = vpack.c.bf16 %v854_v57, %v853_v56 }
 0x1f4   :  { %2084 = vmatmul.mubr.msk.bf16.gmra.mrb[40].mxu1 %vm639_vm0, %v919_v59 }
 0x1f5   :  { %1067 = vmatprep.mubr.bf16.mxu1 %v2558_v1 }
 0x1fa   :  { %v2407_v60 = vpop.f32.mrb[8].mxu1 }
 0x1fb   :  { %v763_v61 = vadd.f32 %v2407_v60, %v2854_v28  ;;  %v754_v62 = vpop.f32.mrb[9].mxu1 }
 0x1fc   :  { %v755_v63 = vadd.f32 %v2854_v28, %v754_v62  ;;  %v2408_v0 = vpop.f32.mrb[10].mxu1  ;;  %2085 = vmatmul.mubr.msk.bf16.gmra.mrb[44].mxu1 %vm639_vm0, %v920_v58  ;;  %v2538_v62 = vld [vmem:[%s3268_s9 + $0x40] sm:$0xff]  }
 0x1fd   :  { %v766_v2 = vadd.f32 %v2408_v0, %v2854_v28  ;;  %v757_v3 = vpop.f32.mrb[11].mxu1  ;;  %1077 = vmatprep.mubr.bf16.mxu1 %v2558_v1  ;;  %v859_v5 = vmax.f32 %v763_v61, 0.0  ;;  %2281 = vmatprep.subr.bf16.mxu0 %v2538_v62 }
 0x1fe   :  { %v758_v4 = vadd.f32 %v2854_v28, %v757_v3  ;;  %v857_v7 = vmax.f32 %v755_v63, 0.0 }
 0x1ff   :  { %v860_v6 = vmax.f32 %v766_v2, 0.0  ;;  %v2539_v2 = vld [vmem:[%s3268_s9] sm:$0xff]  }
 0x200   :  { %v858_v8 = vmax.f32 %v758_v4, 0.0  ;;  %2282 = vmatpush3.bf16.msra.mxu0 %v2539_v2 }
 0x201   :  { %v922_v9 = vpack.c.bf16 %v860_v6, %v859_v5 }
 0x202   :  { %v921_v10 = vpack.c.bf16 %v858_v8, %v857_v7 }
 0x204   :  { %2086 = vmatmul.mubr.msk.bf16.gmra.mrb[48].mxu1 %vm639_vm0, %v921_v10 }
 0x205   :  { %1087 = vmatprep.mubr.bf16.mxu1 %v2558_v1 }
 0x20a   :  { %v2411_v11 = vpop.f32.mrb[12].mxu1 }
 0x20b   :  { %v779_v12 = vadd.f32 %v2411_v11, %v2854_v28  ;;  %v770_v13 = vpop.f32.mrb[13].mxu1 }
 0x20c   :  { %v771_v14 = vadd.f32 %v2854_v28, %v770_v13  ;;  %v2412_v15 = vpop.f32.mrb[14].mxu1  ;;  %2087 = vmatmul.mubr.msk.bf16.gmra.mrb[52].mxu1 %vm639_vm0, %v922_v9  ;;  %v2543_v13 = vld [vmem:[%s3268_s9 + $0x8] sm:$0xff]  }
 0x20d   :  { %v782_v16 = vadd.f32 %v2412_v15, %v2854_v28  ;;  %v773_v17 = vpop.f32.mrb[15].mxu1  ;;  %1097 = vmatprep.mubr.bf16.mxu1 %v2558_v1  ;;  %v863_v19 = vmax.f32 %v779_v12, 0.0  ;;  %v2542_v12 = vld [vmem:[%s3268_s9 + $0x48] sm:$0xff]  }
 0x20e   :  { %v774_v18 = vadd.f32 %v2854_v28, %v773_v17  ;;  %v861_v21 = vmax.f32 %v771_v14, 0.0  ;;  %2283 = vmatprep.subr.bf16.mxu0 %v2542_v12 }
 0x20f   :  { %v864_v20 = vmax.f32 %v782_v16, 0.0  ;;  %2284 = vmatpush3.bf16.msra.mxu0 %v2543_v13 }
 0x210   :  { %v862_v22 = vmax.f32 %v774_v18, 0.0 }
 0x211   :  { %v924_v23 = vpack.c.bf16 %v864_v20, %v863_v19 }
 0x212   :  { %v923_v24 = vpack.c.bf16 %v862_v22, %v861_v21 }
 0x214   :  { %2088 = vmatmul.mubr.msk.bf16.gmra.mrb[56].mxu1 %vm639_vm0, %v923_v24  ;;  %v2548_v24 = vld [vmem:[%s3268_s9 + $0x58] sm:$0xff]  }
 0x215   :  { %1107 = vmatprep.mubr.bf16.mxu1 %v2558_v1 }
 0x21a   :  { %v2415_v25 = vpop.f32.mrb[16].mxu1 }
 0x21b   :  { %v795_v26 = vadd.f32 %v2415_v25, %v2854_v28  ;;  %v786_v27 = vpop.f32.mrb[17].mxu1  ;;  %v2549_v25 = vld [vmem:[%s3268_s9 + $0x18] sm:$0xff]  }
 0x21c   :  { %v787_v29 = vadd.f32 %v2854_v28, %v786_v27  ;;  %v2416_v30 = vpop.f32.mrb[18].mxu1  ;;  %2089 = vmatmul.mubr.msk.bf16.gmra.mrb[60].mxu1 %vm639_vm0, %v924_v23  ;;  %v2546_v23 = vld [vmem:[%s3268_s9 + $0x50] sm:$0xff]   ;;  %v2550_v27 = vld [vmem:[%s3268_s9 + $0x60] sm:$0xff]  }
 0x21d   :  { %v798_v31 = vadd.f32 %v2416_v30, %v2854_v28  ;;  %v789_v32 = vpop.f32.mrb[19].mxu1  ;;  %1117 = vmatprep.mubr.bf16.mxu1 %v2558_v1  ;;  %v867_v34 = vmax.f32 %v795_v26, 0.0  ;;  %2285 = vmatprep.subr.bf16.mxu0 %v2546_v23  ;;  %v2526_v26 = vld [vmem:[%s3267_s3] sm:$0xff]   ;;  %v2552_v30 = vld [vmem:[%s3268_s9 + $0x68] sm:$0xff]  }
 0x21e   :  { %v790_v33 = vadd.f32 %v2854_v28, %v789_v32  ;;  %v865_v36 = vmax.f32 %v787_v29, 0.0  ;;  %v2551_v29 = vld [vmem:[%s3268_s9 + $0x20] sm:$0xff]   ;;  %v2527_v32 = vld [vmem:[%s3267_s3 + $0x8] sm:$0xff]  }
 0x21f   :  { %v868_v35 = vmax.f32 %v798_v31, 0.0  ;;  %v2553_v31 = vld [vmem:[%s3268_s9 + $0x28] sm:$0xff]  }
 0x220   :  { %v866_v37 = vmax.f32 %v790_v33, 0.0  ;;  %v2554_v33 = vld [vmem:[%s3268_s9 + $0x70] sm:$0xff]  }
 0x221   :  { %v926_v38 = vpack.c.bf16 %v868_v35, %v867_v34  ;;  %v2555_v34 = vld [vmem:[%s3268_s9 + $0x30] sm:$0xff]   ;;  %v2556_v35 = vld [vmem:[%s3268_s9 + $0x78] sm:$0xff]  }
 0x222   :  { %v925_v39 = vpack.c.bf16 %v866_v37, %v865_v36  ;;  %v2557_v36 = vld [vmem:[%s3268_s9 + $0x38] sm:$0xff]   ;;  %v2528_v37 = vld [vmem:[%s3267_s3 + $0x10] sm:$0xff]  }
 0x224   :  { %2090 = vmatmul.mubr.msk.bf16.gmra.mrb[64].mxu1 %vm639_vm0, %v925_v39  ;;  %v2530_v39 = vld [vmem:[%s3267_s3 + $0x20] sm:$0xff]  }
 0x225   :  { %1127 = vmatprep.mubr.bf16.mxu1 %v2558_v1 }
 0x22a   :  { %v2419_v40 = vpop.f32.mrb[20].mxu1 }
 0x22b   :  { %v811_v41 = vadd.f32 %v2419_v40, %v2854_v28  ;;  %v802_v42 = vpop.f32.mrb[21].mxu1  ;;  %v2531_v40 = vld [vmem:[%s3267_s3 + $0x28] sm:$0xff]  }
 0x22c   :  { %v803_v43 = vadd.f32 %v2854_v28, %v802_v42  ;;  %v2420_v44 = vpop.f32.mrb[22].mxu1  ;;  %2091 = vmatmul.mubr.msk.bf16.gmra.mrb[68].mxu1 %vm639_vm0, %v926_v38  ;;  %v2529_v38 = vld [vmem:[%s3267_s3 + $0x18] sm:$0xff]  }
 0x22d   :  { %v814_v45 = vadd.f32 %v2420_v44, %v2854_v28  ;;  %v805_v46 = vpop.f32.mrb[23].mxu1  ;;  %1137 = vmatprep.mubr.bf16.mxu1 %v2558_v1  ;;  %v871_v48 = vmax.f32 %v811_v41, 0.0  ;;  %v2532_v41 = vld [vmem:[%s3267_s3 + $0x30] sm:$0xff]   ;;  %v2533_v42 = vld [vmem:[%s3267_s3 + $0x38] sm:$0xff]   ;;  %v2535_v44 = vld [vmem:[%s3267_s3 + $0x48] sm:$0xff]  }
 0x22e   :  { %v806_v47 = vadd.f32 %v2854_v28, %v805_v46  ;;  %v869_v50 = vmax.f32 %v803_v43, 0.0  ;;  %v2534_v43 = vld [vmem:[%s3267_s3 + $0x40] sm:$0xff]   ;;  %v2537_v46 = vld [vmem:[%s3267_s3 + $0x58] sm:$0xff]  }
 0x22f   :  { %v872_v49 = vmax.f32 %v814_v45, 0.0  ;;  %v2536_v45 = vld [vmem:[%s3267_s3 + $0x50] sm:$0xff]  }
 0x230   :  { %v870_v51 = vmax.f32 %v806_v47, 0.0  ;;  %v2540_v47 = vld [vmem:[%s3267_s3 + $0x60] sm:$0xff]  }
 0x231   :  { %v928_v52 = vpack.c.bf16 %v872_v49, %v871_v48  ;;  %v2541_v48 = vld [vmem:[%s3267_s3 + $0x68] sm:$0xff]   ;;  %v2544_v49 = vld [vmem:[%s3267_s3 + $0x70] sm:$0xff]  }
 0x232   :  { %v927_v53 = vpack.c.bf16 %v870_v51, %v869_v50  ;;  %v2545_v50 = vld [vmem:[%s3267_s3 + $0x78] sm:$0xff]   ;;  %v1541_v51 = vlaneseq }
 0x234   :  { %2092 = vmatmul.mubr.msk.bf16.gmra.mrb[72].mxu1 %vm639_vm0, %v927_v53 }
 0x235   :  { %1147 = vmatprep.mubr.bf16.mxu1 %v2558_v1 }
 0x23a   :  { %v2423_v54 = vpop.f32.mrb[24].mxu1 }
 0x23b   :  { %v827_v55 = vadd.f32 %v2423_v54, %v2854_v28  ;;  %v818_v56 = vpop.f32.mrb[25].mxu1  ;;  %v1539_v54 = vld [vmem:[%s3269_s8] sm:$0x3] }
 0x23c   :  { %v819_v57 = vadd.f32 %v2854_v28, %v818_v56  ;;  %v2424_v58 = vpop.f32.mrb[26].mxu1  ;;  %2093 = vmatmul.mubr.msk.bf16.gmra.mrb[76].mxu1 %vm639_vm0, %v928_v52  ;;  %v1542_v52 = vshrl.u32 %v1541_v51, 7 }
 0x23d   :  { %v830_v59 = vadd.f32 %v2424_v58, %v2854_v28  ;;  %v821_v60 = vpop.f32.mrb[27].mxu1  ;;  %1157 = vmatprep.mubr.bf16.mxu1 %v2558_v1  ;;  %v875_v63 = vmax.f32 %v827_v55, 0.0 }
 0x23e   :  { %v822_v61 = vadd.f32 %v2854_v28, %v821_v60  ;;  %v873_v3 = vmax.f32 %v819_v57, 0.0  ;;  %v1543_v53 = vsub.s32 0, %v1542_v52  ;;  %v1547_v55 = vsub.s32 1, %v1542_v52 }
 0x23f   :  { %v876_v0 = vmax.f32 %v830_v59, 0.0 }
 0x240   :  { %v874_v4 = vmax.f32 %v822_v61, 0.0  ;;  %v3059_v56 = vrot.slane %v1539_v54, %v1543_v53  ;;  %v3061_v57 = vrot.slane %v1539_v54, %v1547_v55 }
 0x241   :  { %v930_v5 = vpack.c.bf16 %v876_v0, %v875_v63 }
 0x242   :  { %v929_v6 = vpack.c.bf16 %v874_v4, %v873_v3 }
 0x244   :  { %2094 = vmatmul.mubr.msk.bf16.gmra.mrb[80].mxu1 %vm639_vm0, %v929_v6 }
 0x245   :  { %1167 = vmatprep.mubr.bf16.mxu1 %v2558_v1 }
 0x24a   :  { %v2427_v7 = vpop.f32.mrb[28].mxu1 }
 0x24b   :  { %v843_v8 = vadd.f32 %v2427_v7, %v2854_v28  ;;  %v834_v9 = vpop.f32.mrb[29].mxu1 }
 0x24c   :  { %v835_v10 = vadd.f32 %v2854_v28, %v834_v9  ;;  %v2428_v11 = vpop.f32.mrb[30].mxu1  ;;  %2095 = vmatmul.mubr.msk.bf16.gmra.mrb[84].mxu1 %vm639_vm0, %v930_v5 }
 0x24d   :  { %v846_v14 = vadd.f32 %v2428_v11, %v2854_v28  ;;  %v837_v15 = vpop.f32.mrb[31].mxu1  ;;  %1177 = vmatprep.mubr.bf16.mxu1 %v2558_v1  ;;  %v879_v17 = vmax.f32 %v843_v8, 0.0 }
 0x24e   :  { %v838_v16 = vadd.f32 %v2854_v28, %v837_v15  ;;  %v877_v19 = vmax.f32 %v835_v10, 0.0  ;;  %v2547_v28 = vld [vmem:[%s3268_s9 + $0x10] sm:$0xff]  }
 0x24f   :  { %v880_v18 = vmax.f32 %v846_v14, 0.0  ;;  %2286 = vmatpush3.bf16.msra.mxu0 %v2547_v28 }
 0x250   :  { %v878_v20 = vmax.f32 %v838_v16, 0.0  ;;  %2287 = vmatprep.subr.bf16.mxu0 %v2548_v24 }
 0x251   :  { %v932_v21 = vpack.c.bf16 %v880_v18, %v879_v17 }
 0x252   :  { %v931_v22 = vpack.c.bf16 %v878_v20, %v877_v19 }
 0x253   :  { %2288 = vmatpush3.bf16.msra.mxu0 %v2549_v25 }
 0x254   :  { %2096 = vmatmul.mubr.msk.bf16.gmra.mrb[88].mxu1 %vm639_vm0, %v931_v22  ;;  %2289 = vmatprep.subr.bf16.mxu0 %v2550_v27 }
 0x255   :  { %1187 = vmatprep.mubr.bf16.mxu1 %v2558_v1 }
 0x257   :  { %2290 = vmatpush3.bf16.msra.mxu0 %v2551_v29 }
 0x258   :  { %2291 = vmatprep.subr.bf16.mxu0 %v2552_v30 }
 0x25b   :  { %2292 = vmatpush3.bf16.msra.mxu0 %v2553_v31 }
 0x25c   :  { %2097 = vmatmul.mubr.msk.bf16.gmra.mrb[92].mxu1 %vm639_vm0, %v932_v21  ;;  %2293 = vmatprep.subr.bf16.mxu0 %v2554_v33 }
 0x25d   :  { %1378 = vmatprep.mubr.bf16.mxu1 %v2558_v1 }
 0x25f   :  { %2294 = vmatpush3.bf16.msra.mxu0 %v2555_v34 }
 0x260   :  { %2295 = vmatprep.subr.bf16.mxu0 %v2556_v35 }
 0x263   :  { %2296 = vmatpush3.bf16.msra.mxu0 %v2557_v36 }
 0x264   :  { %2118 = vmatmul.mubr.msk.bf16.vlgmr.msra.gmra.mrb[32].mxu1 %vm639_vm0, %v2526_v26 }
 0x265   :  { %1388 = vmatprep.mubr.bf16.mxu1 %v2558_v1 }
 0x26c   :  { %2119 = vmatmul.mubr.msk.bf16.gmra.mrb[36].mxu1 %vm639_vm0, %v2527_v32 }
 0x26d   :  { %1398 = vmatprep.mubr.bf16.mxu1 %v2558_v1 }
 0x274   :  { %2120 = vmatmul.mubr.msk.bf16.gmra.mrb[40].mxu1 %vm639_vm0, %v2528_v37 }
 0x275   :  { %1408 = vmatprep.mubr.bf16.mxu1 %v2558_v1 }
 0x27c   :  { %2121 = vmatmul.mubr.msk.bf16.gmra.mrb[44].mxu1 %vm639_vm0, %v2529_v38 }
 0x27d   :  { %1418 = vmatprep.mubr.bf16.mxu1 %v2558_v1 }
 0x284   :  { %2122 = vmatmul.mubr.msk.bf16.gmra.mrb[48].mxu1 %vm639_vm0, %v2530_v39 }
 0x285   :  { %1428 = vmatprep.mubr.bf16.mxu1 %v2558_v1 }
 0x28c   :  { %2123 = vmatmul.mubr.msk.bf16.gmra.mrb[52].mxu1 %vm639_vm0, %v2531_v40 }
 0x28d   :  { %1438 = vmatprep.mubr.bf16.mxu1 %v2558_v1 }
 0x294   :  { %2124 = vmatmul.mubr.msk.bf16.gmra.mrb[56].mxu1 %vm639_vm0, %v2532_v41 }
 0x295   :  { %1448 = vmatprep.mubr.bf16.mxu1 %v2558_v1 }
 0x29c   :  { %2125 = vmatmul.mubr.msk.bf16.gmra.mrb[60].mxu1 %vm639_vm0, %v2533_v42 }
 0x29d   :  { %1458 = vmatprep.mubr.bf16.mxu1 %v2558_v1 }
 0x2a4   :  { %2126 = vmatmul.mubr.msk.bf16.gmra.mrb[64].mxu1 %vm639_vm0, %v2534_v43 }
 0x2a5   :  { %1468 = vmatprep.mubr.bf16.mxu1 %v2558_v1 }
 0x2ac   :  { %2127 = vmatmul.mubr.msk.bf16.gmra.mrb[68].mxu1 %vm639_vm0, %v2535_v44 }
 0x2ad   :  { %1478 = vmatprep.mubr.bf16.mxu1 %v2558_v1 }
 0x2b4   :  { %2128 = vmatmul.mubr.msk.bf16.gmra.mrb[72].mxu1 %vm639_vm0, %v2536_v45 }
 0x2b5   :  { %1488 = vmatprep.mubr.bf16.mxu1 %v2558_v1 }
 0x2bc   :  { %2129 = vmatmul.mubr.msk.bf16.gmra.mrb[76].mxu1 %vm639_vm0, %v2537_v46 }
 0x2bd   :  { %1498 = vmatprep.mubr.bf16.mxu1 %v2558_v1 }
 0x2c4   :  { %2130 = vmatmul.mubr.msk.bf16.gmra.mrb[80].mxu1 %vm639_vm0, %v2540_v47 }
 0x2c5   :  { %1508 = vmatprep.mubr.bf16.mxu1 %v2558_v1 }
 0x2cc   :  { %2131 = vmatmul.mubr.msk.bf16.gmra.mrb[84].mxu1 %vm639_vm0, %v2541_v48 }
 0x2cd   :  { %1518 = vmatprep.mubr.bf16.mxu1 %v2558_v1 }
 0x2d4   :  { %2132 = vmatmul.mubr.msk.bf16.gmra.mrb[88].mxu1 %vm639_vm0, %v2544_v49 }
 0x2d5   :  { %1528 = vmatprep.mubr.bf16.mxu1 %v2558_v1 }
 0x2dc   :  { %2133 = vmatmul.mubr.msk.bf16.gmra.mrb[92].mxu1 %vm639_vm0, %v2545_v50 }
 0x337   :  { %v1380_v58 = vpop.f32.mrb[32].mxu1 }
 0x338   :  { %v1551_v1 = vadd.f32 %v3059_v56, %v1380_v58  ;;  %v1382_v59 = vpop.f32.mrb[33].mxu1 }
 0x339   :  { %v1552_v60 = vadd.f32 %v3061_v57, %v1382_v59  ;;  %v1384_v61 = vpop.f32.mrb[34].mxu1 }
 0x33a   :  { %v1553_v62 = vadd.f32 %v3059_v56, %v1384_v61  ;;  %v1386_v63 = vpop.f32.mrb[35].mxu1  ;;  %v1615_v2 = vmax.f32 %v1551_v1, 0.0 }
 0x33b   :  { %v1554_v0 = vadd.f32 %v3061_v57, %v1386_v63  ;;  %v1616_v4 = vmax.f32 %v1552_v60, 0.0 }
 0x33c   :  { %v1617_v3 = vmax.f32 %v1553_v62, 0.0 }
 0x33d   :  { %v1618_v5 = vmax.f32 %v1554_v0, 0.0 }
 0x33e   :  { %v1679_v6 = vpack.c.bf16 %v1617_v3, %v1615_v2 }
 0x33f   :  { %v1680_v7 = vpack.c.bf16 %v1618_v5, %v1616_v4  ;;  %v1390_v8 = vpop.f32.mrb[36].mxu1 }
 0x340   :  { %v1555_v9 = vadd.f32 %v3059_v56, %v1390_v8  ;;  %v1392_v10 = vpop.f32.mrb[37].mxu1 }
 0x341   :  { %v1556_v11 = vadd.f32 %v3061_v57, %v1392_v10  ;;  %v1394_v12 = vpop.f32.mrb[38].mxu1  ;;  %1878 = vmatprep.mubr.bf16.mxu0 %v1680_v7 }
 0x342   :  { %v1557_v13 = vadd.f32 %v3059_v56, %v1394_v12  ;;  %v1396_v14 = vpop.f32.mrb[39].mxu1  ;;  %1879 = vmatmul.mubr.bf16.vlgmr.msra.gmra.mrb[64].mxu0 %v1679_v6  ;;  %v1619_v16 = vmax.f32 %v1555_v9, 0.0 }
 0x343   :  { %v1558_v15 = vadd.f32 %v3061_v57, %v1396_v14  ;;  %v1620_v18 = vmax.f32 %v1556_v11, 0.0 }
 0x344   :  { %v1621_v17 = vmax.f32 %v1557_v13, 0.0 }
 0x345   :  { %v1622_v19 = vmax.f32 %v1558_v15, 0.0 }
 0x346   :  { %v1681_v20 = vpack.c.bf16 %v1621_v17, %v1619_v16 }
 0x347   :  { %v1682_v21 = vpack.c.bf16 %v1622_v19, %v1620_v18  ;;  %v1400_v22 = vpop.f32.mrb[40].mxu1 }
 0x348   :  { %v1559_v23 = vadd.f32 %v3059_v56, %v1400_v22  ;;  %v1402_v28 = vpop.f32.mrb[41].mxu1 }
 0x349   :  { %v1560_v24 = vadd.f32 %v3061_v57, %v1402_v28  ;;  %v1404_v25 = vpop.f32.mrb[42].mxu1  ;;  %1886 = vmatprep.mubr.bf16.mxu0 %v1682_v21 }
 0x34a   :  { %v1561_v26 = vadd.f32 %v3059_v56, %v1404_v25  ;;  %v1406_v27 = vpop.f32.mrb[43].mxu1  ;;  %1887 = vmatmul.mubr.bf16.gmra.mrb[68].mxu0 %v1681_v20  ;;  %v1623_v30 = vmax.f32 %v1559_v23, 0.0 }
 0x34b   :  { %v1562_v29 = vadd.f32 %v3061_v57, %v1406_v27  ;;  %v1624_v32 = vmax.f32 %v1560_v24, 0.0 }
 0x34c   :  { %v1625_v31 = vmax.f32 %v1561_v26, 0.0 }
 0x34d   :  { %v1626_v33 = vmax.f32 %v1562_v29, 0.0 }
 0x34e   :  { %v1683_v34 = vpack.c.bf16 %v1625_v31, %v1623_v30 }
 0x34f   :  { %v1684_v35 = vpack.c.bf16 %v1626_v33, %v1624_v32  ;;  %v1410_v36 = vpop.f32.mrb[44].mxu1 }
 0x350   :  { %v1563_v37 = vadd.f32 %v3059_v56, %v1410_v36  ;;  %v1412_v38 = vpop.f32.mrb[45].mxu1 }
 0x351   :  { %v1564_v39 = vadd.f32 %v3061_v57, %v1412_v38  ;;  %v1414_v40 = vpop.f32.mrb[46].mxu1  ;;  %1894 = vmatprep.mubr.bf16.mxu0 %v1684_v35 }
 0x352   :  { %v1565_v41 = vadd.f32 %v3059_v56, %v1414_v40  ;;  %v1416_v42 = vpop.f32.mrb[47].mxu1  ;;  %1895 = vmatmul.mubr.bf16.gmra.mrb[72].mxu0 %v1683_v34  ;;  %v1627_v44 = vmax.f32 %v1563_v37, 0.0 }
 0x353   :  { %v1566_v43 = vadd.f32 %v3061_v57, %v1416_v42  ;;  %v1628_v46 = vmax.f32 %v1564_v39, 0.0 }
 0x354   :  { %v1629_v45 = vmax.f32 %v1565_v41, 0.0 }
 0x355   :  { %v1630_v47 = vmax.f32 %v1566_v43, 0.0 }
 0x356   :  { %v1685_v48 = vpack.c.bf16 %v1629_v45, %v1627_v44 }
 0x357   :  { %v1686_v49 = vpack.c.bf16 %v1630_v47, %v1628_v46  ;;  %v1420_v50 = vpop.f32.mrb[48].mxu1 }
 0x358   :  { %v1567_v51 = vadd.f32 %v3059_v56, %v1420_v50  ;;  %v1422_v52 = vpop.f32.mrb[49].mxu1 }
 0x359   :  { %v1568_v53 = vadd.f32 %v3061_v57, %v1422_v52  ;;  %v1424_v54 = vpop.f32.mrb[50].mxu1  ;;  %1902 = vmatprep.mubr.bf16.mxu0 %v1686_v49 }
 0x35a   :  { %v1569_v55 = vadd.f32 %v3059_v56, %v1424_v54  ;;  %v1426_v58 = vpop.f32.mrb[51].mxu1  ;;  %1903 = vmatmul.mubr.bf16.gmra.mrb[76].mxu0 %v1685_v48  ;;  %v1631_v59 = vmax.f32 %v1567_v51, 0.0 }
 0x35b   :  { %v1570_v1 = vadd.f32 %v3061_v57, %v1426_v58  ;;  %v1632_v61 = vmax.f32 %v1568_v53, 0.0 }
 0x35c   :  { %v1633_v60 = vmax.f32 %v1569_v55, 0.0 }
 0x35d   :  { %v1634_v62 = vmax.f32 %v1570_v1, 0.0 }
 0x35e   :  { %v1687_v63 = vpack.c.bf16 %v1633_v60, %v1631_v59 }
 0x35f   :  { %v1688_v0 = vpack.c.bf16 %v1634_v62, %v1632_v61  ;;  %v1430_v2 = vpop.f32.mrb[52].mxu1 }
 0x360   :  { %v1571_v3 = vadd.f32 %v3059_v56, %v1430_v2  ;;  %v1432_v4 = vpop.f32.mrb[53].mxu1 }
 0x361   :  { %v1572_v5 = vadd.f32 %v3061_v57, %v1432_v4  ;;  %v1434_v6 = vpop.f32.mrb[54].mxu1  ;;  %1910 = vmatprep.mubr.bf16.mxu0 %v1688_v0 }
 0x362   :  { %v1573_v7 = vadd.f32 %v3059_v56, %v1434_v6  ;;  %v1436_v8 = vpop.f32.mrb[55].mxu1  ;;  %1911 = vmatmul.mubr.bf16.gmra.mrb[80].mxu0 %v1687_v63  ;;  %v1635_v10 = vmax.f32 %v1571_v3, 0.0 }
 0x363   :  { %v1574_v9 = vadd.f32 %v3061_v57, %v1436_v8  ;;  %v1636_v12 = vmax.f32 %v1572_v5, 0.0 }
 0x364   :  { %v1637_v11 = vmax.f32 %v1573_v7, 0.0 }
 0x365   :  { %v1638_v13 = vmax.f32 %v1574_v9, 0.0 }
 0x366   :  { %v1689_v14 = vpack.c.bf16 %v1637_v11, %v1635_v10 }
 0x367   :  { %v1690_v15 = vpack.c.bf16 %v1638_v13, %v1636_v12  ;;  %v1440_v16 = vpop.f32.mrb[56].mxu1 }
 0x368   :  { %v1575_v17 = vadd.f32 %v3059_v56, %v1440_v16  ;;  %v1442_v18 = vpop.f32.mrb[57].mxu1 }
 0x369   :  { %v1576_v19 = vadd.f32 %v3061_v57, %v1442_v18  ;;  %v1444_v20 = vpop.f32.mrb[58].mxu1  ;;  %1918 = vmatprep.mubr.bf16.mxu0 %v1690_v15 }
 0x36a   :  { %v1577_v21 = vadd.f32 %v3059_v56, %v1444_v20  ;;  %v1446_v22 = vpop.f32.mrb[59].mxu1  ;;  %1919 = vmatmul.mubr.bf16.gmra.mrb[84].mxu0 %v1689_v14  ;;  %v1639_v28 = vmax.f32 %v1575_v17, 0.0 }
 0x36b   :  { %v1578_v23 = vadd.f32 %v3061_v57, %v1446_v22  ;;  %v1640_v25 = vmax.f32 %v1576_v19, 0.0 }
 0x36c   :  { %v1641_v24 = vmax.f32 %v1577_v21, 0.0 }
 0x36d   :  { %v1642_v26 = vmax.f32 %v1578_v23, 0.0 }
 0x36e   :  { %v1691_v27 = vpack.c.bf16 %v1641_v24, %v1639_v28 }
 0x36f   :  { %v1692_v29 = vpack.c.bf16 %v1642_v26, %v1640_v25  ;;  %v1450_v30 = vpop.f32.mrb[60].mxu1 }
 0x370   :  { %v1579_v31 = vadd.f32 %v3059_v56, %v1450_v30  ;;  %v1452_v32 = vpop.f32.mrb[61].mxu1 }
 0x371   :  { %v1580_v33 = vadd.f32 %v3061_v57, %v1452_v32  ;;  %v1454_v34 = vpop.f32.mrb[62].mxu1  ;;  %1926 = vmatprep.mubr.bf16.mxu0 %v1692_v29 }
 0x372   :  { %v1581_v35 = vadd.f32 %v3059_v56, %v1454_v34  ;;  %v1456_v36 = vpop.f32.mrb[63].mxu1  ;;  %1927 = vmatmul.mubr.bf16.gmra.mrb[88].mxu0 %v1691_v27  ;;  %v1643_v38 = vmax.f32 %v1579_v31, 0.0 }
 0x373   :  { %v1582_v37 = vadd.f32 %v3061_v57, %v1456_v36  ;;  %v1644_v40 = vmax.f32 %v1580_v33, 0.0 }
 0x374   :  { %v1645_v39 = vmax.f32 %v1581_v35, 0.0 }
 0x375   :  { %v1646_v41 = vmax.f32 %v1582_v37, 0.0 }
 0x376   :  { %v1693_v42 = vpack.c.bf16 %v1645_v39, %v1643_v38 }
 0x377   :  { %v1694_v43 = vpack.c.bf16 %v1646_v41, %v1644_v40  ;;  %v1460_v44 = vpop.f32.mrb[64].mxu1 }
 0x378   :  { %v1583_v45 = vadd.f32 %v3059_v56, %v1460_v44  ;;  %v1462_v46 = vpop.f32.mrb[65].mxu1 }
 0x379   :  { %v1584_v47 = vadd.f32 %v3061_v57, %v1462_v46  ;;  %v1464_v48 = vpop.f32.mrb[66].mxu1  ;;  %1934 = vmatprep.mubr.bf16.mxu0 %v1694_v43 }
 0x37a   :  { %v1585_v49 = vadd.f32 %v3059_v56, %v1464_v48  ;;  %v1466_v50 = vpop.f32.mrb[67].mxu1  ;;  %1935 = vmatmul.mubr.bf16.gmra.mrb[92].mxu0 %v1693_v42  ;;  %v1647_v52 = vmax.f32 %v1583_v45, 0.0 }
 0x37b   :  { %v1586_v51 = vadd.f32 %v3061_v57, %v1466_v50  ;;  %v1648_v54 = vmax.f32 %v1584_v47, 0.0 }
 0x37c   :  { %v1649_v53 = vmax.f32 %v1585_v49, 0.0 }
 0x37d   :  { %v1650_v55 = vmax.f32 %v1586_v51, 0.0 }
 0x37e   :  { %v1695_v58 = vpack.c.bf16 %v1649_v53, %v1647_v52 }
 0x37f   :  { %v1696_v1 = vpack.c.bf16 %v1650_v55, %v1648_v54  ;;  %v1470_v59 = vpop.f32.mrb[68].mxu1 }
 0x380   :  { %v1587_v60 = vadd.f32 %v3059_v56, %v1470_v59  ;;  %v1472_v61 = vpop.f32.mrb[69].mxu1 }
 0x381   :  { %v1588_v62 = vadd.f32 %v3061_v57, %v1472_v61  ;;  %v1474_v63 = vpop.f32.mrb[70].mxu1  ;;  %1942 = vmatprep.mubr.bf16.mxu0 %v1696_v1 }
 0x382   :  { %v1589_v0 = vadd.f32 %v3059_v56, %v1474_v63  ;;  %v1476_v2 = vpop.f32.mrb[71].mxu1  ;;  %1943 = vmatmul.mubr.bf16.gmra.mrb[96].mxu0 %v1695_v58  ;;  %v1651_v4 = vmax.f32 %v1587_v60, 0.0 }
 0x383   :  { %v1590_v3 = vadd.f32 %v3061_v57, %v1476_v2  ;;  %v1652_v6 = vmax.f32 %v1588_v62, 0.0 }
 0x384   :  { %v1653_v5 = vmax.f32 %v1589_v0, 0.0 }
 0x385   :  { %v1654_v7 = vmax.f32 %v1590_v3, 0.0 }
 0x386   :  { %v1697_v8 = vpack.c.bf16 %v1653_v5, %v1651_v4 }
 0x387   :  { %v1698_v9 = vpack.c.bf16 %v1654_v7, %v1652_v6  ;;  %v1480_v10 = vpop.f32.mrb[72].mxu1 }
 0x388   :  { %v1591_v11 = vadd.f32 %v3059_v56, %v1480_v10  ;;  %v1482_v12 = vpop.f32.mrb[73].mxu1 }
 0x389   :  { %v1592_v13 = vadd.f32 %v3061_v57, %v1482_v12  ;;  %v1484_v14 = vpop.f32.mrb[74].mxu1  ;;  %1950 = vmatprep.mubr.bf16.mxu0 %v1698_v9 }
 0x38a   :  { %v1593_v15 = vadd.f32 %v3059_v56, %v1484_v14  ;;  %v1486_v16 = vpop.f32.mrb[75].mxu1  ;;  %1951 = vmatmul.mubr.bf16.gmra.mrb[100].mxu0 %v1697_v8  ;;  %v1655_v18 = vmax.f32 %v1591_v11, 0.0 }
 0x38b   :  { %v1594_v17 = vadd.f32 %v3061_v57, %v1486_v16  ;;  %v1656_v20 = vmax.f32 %v1592_v13, 0.0 }
 0x38c   :  { %v1657_v19 = vmax.f32 %v1593_v15, 0.0 }
 0x38d   :  { %v1658_v21 = vmax.f32 %v1594_v17, 0.0 }
 0x38e   :  { %v1699_v22 = vpack.c.bf16 %v1657_v19, %v1655_v18 }
 0x38f   :  { %v1700_v23 = vpack.c.bf16 %v1658_v21, %v1656_v20  ;;  %v1490_v28 = vpop.f32.mrb[76].mxu1 }
 0x390   :  { %v1595_v24 = vadd.f32 %v3059_v56, %v1490_v28  ;;  %v1492_v25 = vpop.f32.mrb[77].mxu1 }
 0x391   :  { %v1596_v26 = vadd.f32 %v3061_v57, %v1492_v25  ;;  %v1494_v27 = vpop.f32.mrb[78].mxu1  ;;  %1958 = vmatprep.mubr.bf16.mxu0 %v1700_v23 }
 0x392   :  { %v1597_v29 = vadd.f32 %v3059_v56, %v1494_v27  ;;  %v1496_v30 = vpop.f32.mrb[79].mxu1  ;;  %1959 = vmatmul.mubr.bf16.gmra.mrb[104].mxu0 %v1699_v22  ;;  %v1659_v32 = vmax.f32 %v1595_v24, 0.0 }
 0x393   :  { %v1598_v31 = vadd.f32 %v3061_v57, %v1496_v30  ;;  %v1660_v34 = vmax.f32 %v1596_v26, 0.0 }
 0x394   :  { %v1661_v33 = vmax.f32 %v1597_v29, 0.0 }
 0x395   :  { %v1662_v35 = vmax.f32 %v1598_v31, 0.0 }
 0x396   :  { %v1701_v36 = vpack.c.bf16 %v1661_v33, %v1659_v32  ;;  %v3130_v33 = vld [vmem:[%s3270_s10] ss:$0 sm:$0xff] }
 0x397   :  { %v1702_v37 = vpack.c.bf16 %v1662_v35, %v1660_v34  ;;  %v1500_v38 = vpop.f32.mrb[80].mxu1 }
 0x398   :  { %v1599_v39 = vadd.f32 %v3059_v56, %v1500_v38  ;;  %v1502_v40 = vpop.f32.mrb[81].mxu1 }
 0x399   :  { %v1600_v41 = vadd.f32 %v3061_v57, %v1502_v40  ;;  %v1504_v42 = vpop.f32.mrb[82].mxu1  ;;  %1966 = vmatprep.mubr.bf16.mxu0 %v1702_v37 }
 0x39a   :  { %v1601_v43 = vadd.f32 %v3059_v56, %v1504_v42  ;;  %v1506_v44 = vpop.f32.mrb[83].mxu1  ;;  %1967 = vmatmul.mubr.bf16.gmra.mrb[108].mxu0 %v1701_v36  ;;  %v1663_v46 = vmax.f32 %v1599_v39, 0.0 }
 0x39b   :  { %v1602_v45 = vadd.f32 %v3061_v57, %v1506_v44  ;;  %v1664_v48 = vmax.f32 %v1600_v41, 0.0 }
 0x39c   :  { %v1665_v47 = vmax.f32 %v1601_v43, 0.0 }
 0x39d   :  { %v1666_v49 = vmax.f32 %v1602_v45, 0.0 }
 0x39e   :  { %v1703_v50 = vpack.c.bf16 %v1665_v47, %v1663_v46 }
 0x39f   :  { %v1704_v51 = vpack.c.bf16 %v1666_v49, %v1664_v48  ;;  %v1510_v52 = vpop.f32.mrb[84].mxu1 }
 0x3a0   :  { %v1603_v53 = vadd.f32 %v3059_v56, %v1510_v52  ;;  %v1512_v54 = vpop.f32.mrb[85].mxu1 }
 0x3a1   :  { %v1604_v55 = vadd.f32 %v3061_v57, %v1512_v54  ;;  %v1514_v58 = vpop.f32.mrb[86].mxu1  ;;  %1974 = vmatprep.mubr.bf16.mxu0 %v1704_v51 }
 0x3a2   :  { %v1605_v1 = vadd.f32 %v3059_v56, %v1514_v58  ;;  %v1516_v59 = vpop.f32.mrb[87].mxu1  ;;  %1975 = vmatmul.mubr.bf16.gmra.mrb[112].mxu0 %v1703_v50  ;;  %v1667_v61 = vmax.f32 %v1603_v53, 0.0 }
 0x3a3   :  { %v1606_v60 = vadd.f32 %v3061_v57, %v1516_v59  ;;  %v1668_v63 = vmax.f32 %v1604_v55, 0.0 }
 0x3a4   :  { %v1669_v62 = vmax.f32 %v1605_v1, 0.0 }
 0x3a5   :  { %v1670_v0 = vmax.f32 %v1606_v60, 0.0 }
 0x3a6   :  { %v1705_v2 = vpack.c.bf16 %v1669_v62, %v1667_v61 }
 0x3a7   :  { %v1706_v3 = vpack.c.bf16 %v1670_v0, %v1668_v63  ;;  %v1520_v4 = vpop.f32.mrb[88].mxu1 }
 0x3a8   :  { %v1607_v5 = vadd.f32 %v3059_v56, %v1520_v4  ;;  %v1522_v6 = vpop.f32.mrb[89].mxu1 }
 0x3a9   :  { %v1608_v7 = vadd.f32 %v3061_v57, %v1522_v6  ;;  %v1524_v8 = vpop.f32.mrb[90].mxu1  ;;  %1982 = vmatprep.mubr.bf16.mxu0 %v1706_v3 }
 0x3aa   :  { %v1609_v9 = vadd.f32 %v3059_v56, %v1524_v8  ;;  %v1526_v10 = vpop.f32.mrb[91].mxu1  ;;  %1983 = vmatmul.mubr.bf16.gmra.mrb[116].mxu0 %v1705_v2  ;;  %v1671_v12 = vmax.f32 %v1607_v5, 0.0 }
 0x3ab   :  { %v1610_v11 = vadd.f32 %v3061_v57, %v1526_v10  ;;  %v1672_v14 = vmax.f32 %v1608_v7, 0.0 }
 0x3ac   :  { %v1673_v13 = vmax.f32 %v1609_v9, 0.0 }
 0x3ad   :  { %v1674_v15 = vmax.f32 %v1610_v11, 0.0 }
 0x3ae   :  { %v1707_v16 = vpack.c.bf16 %v1673_v13, %v1671_v12 }
 0x3af   :  { %v1708_v17 = vpack.c.bf16 %v1674_v15, %v1672_v14  ;;  %v1530_v18 = vpop.f32.mrb[92].mxu1 }
 0x3b0   :  { %v1611_v19 = vadd.f32 %v3059_v56, %v1530_v18  ;;  %v1532_v20 = vpop.f32.mrb[93].mxu1 }
 0x3b1   :  { %v1612_v21 = vadd.f32 %v3061_v57, %v1532_v20  ;;  %v1534_v22 = vpop.f32.mrb[94].mxu1  ;;  %1990 = vmatprep.mubr.bf16.mxu0 %v1708_v17 }
 0x3b2   :  { %v1613_v23 = vadd.f32 %v3059_v56, %v1534_v22  ;;  %v1536_v28 = vpop.f32.mrb[95].mxu1  ;;  %1991 = vmatmul.mubr.bf16.gmra.mrb[120].mxu0 %v1707_v16  ;;  %v1675_v25 = vmax.f32 %v1611_v19, 0.0 }
 0x3b3   :  { %v1614_v24 = vadd.f32 %v3061_v57, %v1536_v28  ;;  %v1676_v27 = vmax.f32 %v1612_v21, 0.0 }
 0x3b4   :  { %v1677_v26 = vmax.f32 %v1613_v23, 0.0 }
 0x3b5   :  { %v1678_v29 = vmax.f32 %v1614_v24, 0.0 }
 0x3b6   :  { %v1709_v30 = vpack.c.bf16 %v1677_v26, %v1675_v25 }
 0x3b7   :  { %v1710_v31 = vpack.c.bf16 %v1678_v29, %v1676_v27 }
 0x3b9   :  { %1998 = vmatprep.mubr.bf16.mxu0 %v1710_v31 }
 0x3ba   :  { %1999 = vmatmul.mubr.bf16.gmra.mrb[124].mxu0 %v1709_v30 }
 0x415   :  { %v2297_v32 = vpop.f32.mrb[64].mxu0 }
 0x416   :  { %v2298_v34 = vpop.f32.mrb[65].mxu0 }
 0x417   :  { %v2299_v56 = vadd.f32 %v2298_v34, %v2297_v32  ;;  %v2300_v35 = vpop.f32.mrb[66].mxu0 }
 0x418   :  { %v2301_v36 = vpop.f32.mrb[67].mxu0 }
 0x419   :  { %v1881_v57 = vadd.f32 %v2299_v56, %v3130_v33  ;;  %v2302_v37 = vadd.f32 %v2301_v36, %v2300_v35 }
 0x41b   :  { %2007 = vst [vmem:[%s3271_s11] sm:$0xff] %v1881_v57  ;;  %v1884_v38 = vadd.f32 %v2302_v37, %v3130_v33 }
 0x41d   :  { %2008 = vst [vmem:[%s3271_s11 + $0x8] sm:$0xff] %v1884_v38  ;;  %v2303_v39 = vpop.f32.mrb[68].mxu0 }
 0x41e   :  { %v2304_v40 = vpop.f32.mrb[69].mxu0 }
 0x41f   :  { %v2305_v41 = vadd.f32 %v2304_v40, %v2303_v39  ;;  %v2306_v42 = vpop.f32.mrb[70].mxu0 }
 0x420   :  { %v2307_v43 = vpop.f32.mrb[71].mxu0 }
 0x421   :  { %v1889_v44 = vadd.f32 %v2305_v41, %v3130_v33  ;;  %v2308_v45 = vadd.f32 %v2307_v43, %v2306_v42 }
 0x423   :  { %2009 = vst [vmem:[%s3271_s11 + $0x10] sm:$0xff] %v1889_v44  ;;  %v1892_v46 = vadd.f32 %v2308_v45, %v3130_v33 }
 0x425   :  { %2010 = vst [vmem:[%s3271_s11 + $0x18] sm:$0xff] %v1892_v46  ;;  %v2309_v47 = vpop.f32.mrb[72].mxu0 }
 0x426   :  { %v2310_v48 = vpop.f32.mrb[73].mxu0 }
 0x427   :  { %v2311_v49 = vadd.f32 %v2310_v48, %v2309_v47  ;;  %v2312_v50 = vpop.f32.mrb[74].mxu0 }
 0x428   :  { %v2313_v51 = vpop.f32.mrb[75].mxu0 }
 0x429   :  { %v1897_v52 = vadd.f32 %v2311_v49, %v3130_v33  ;;  %v2314_v53 = vadd.f32 %v2313_v51, %v2312_v50 }
 0x42b   :  { %2011 = vst [vmem:[%s3271_s11 + $0x20] sm:$0xff] %v1897_v52  ;;  %v1900_v54 = vadd.f32 %v2314_v53, %v3130_v33 }
 0x42d   :  { %2012 = vst [vmem:[%s3271_s11 + $0x28] sm:$0xff] %v1900_v54  ;;  %v2315_v55 = vpop.f32.mrb[76].mxu0 }
 0x42e   :  { %v2316_v58 = vpop.f32.mrb[77].mxu0 }
 0x42f   :  { %v2317_v1 = vadd.f32 %v2316_v58, %v2315_v55  ;;  %v2318_v59 = vpop.f32.mrb[78].mxu0 }
 0x430   :  { %v2319_v60 = vpop.f32.mrb[79].mxu0 }
 0x431   :  { %v1905_v61 = vadd.f32 %v2317_v1, %v3130_v33  ;;  %v2320_v62 = vadd.f32 %v2319_v60, %v2318_v59 }
 0x433   :  { %2013 = vst [vmem:[%s3271_s11 + $0x30] sm:$0xff] %v1905_v61  ;;  %v1908_v63 = vadd.f32 %v2320_v62, %v3130_v33 }
 0x435   :  { %2014 = vst [vmem:[%s3271_s11 + $0x38] sm:$0xff] %v1908_v63  ;;  %v2321_v0 = vpop.f32.mrb[80].mxu0 }
 0x436   :  { %v2322_v2 = vpop.f32.mrb[81].mxu0 }
 0x437   :  { %v2323_v3 = vadd.f32 %v2322_v2, %v2321_v0  ;;  %v2324_v4 = vpop.f32.mrb[82].mxu0 }
 0x438   :  { %v2325_v5 = vpop.f32.mrb[83].mxu0 }
 0x439   :  { %v1913_v6 = vadd.f32 %v2323_v3, %v3130_v33  ;;  %v2326_v7 = vadd.f32 %v2325_v5, %v2324_v4 }
 0x43b   :  { %2015 = vst [vmem:[%s3271_s11 + $0x40] sm:$0xff] %v1913_v6  ;;  %v1916_v8 = vadd.f32 %v2326_v7, %v3130_v33 }
 0x43d   :  { %2016 = vst [vmem:[%s3271_s11 + $0x48] sm:$0xff] %v1916_v8  ;;  %v2327_v9 = vpop.f32.mrb[84].mxu0 }
 0x43e   :  { %v2328_v10 = vpop.f32.mrb[85].mxu0 }
 0x43f   :  { %v2329_v11 = vadd.f32 %v2328_v10, %v2327_v9  ;;  %v2330_v12 = vpop.f32.mrb[86].mxu0 }
 0x440   :  { %v2331_v13 = vpop.f32.mrb[87].mxu0 }
 0x441   :  { %v1921_v14 = vadd.f32 %v2329_v11, %v3130_v33  ;;  %v2332_v15 = vadd.f32 %v2331_v13, %v2330_v12 }
 0x443   :  { %2017 = vst [vmem:[%s3271_s11 + $0x50] sm:$0xff] %v1921_v14  ;;  %v1924_v16 = vadd.f32 %v2332_v15, %v3130_v33 }
 0x445   :  { %2018 = vst [vmem:[%s3271_s11 + $0x58] sm:$0xff] %v1924_v16  ;;  %v2333_v17 = vpop.f32.mrb[88].mxu0 }
 0x446   :  { %v2334_v18 = vpop.f32.mrb[89].mxu0 }
 0x447   :  { %v2335_v19 = vadd.f32 %v2334_v18, %v2333_v17  ;;  %v2336_v20 = vpop.f32.mrb[90].mxu0 }
 0x448   :  { %v2337_v21 = vpop.f32.mrb[91].mxu0 }
 0x449   :  { %v1929_v22 = vadd.f32 %v2335_v19, %v3130_v33  ;;  %v2338_v23 = vadd.f32 %v2337_v21, %v2336_v20 }
 0x44b   :  { %2019 = vst [vmem:[%s3271_s11 + $0x60] sm:$0xff] %v1929_v22  ;;  %v1932_v28 = vadd.f32 %v2338_v23, %v3130_v33 }
 0x44d   :  { %2020 = vst [vmem:[%s3271_s11 + $0x68] sm:$0xff] %v1932_v28  ;;  %v2339_v24 = vpop.f32.mrb[92].mxu0 }
 0x44e   :  { %v2340_v25 = vpop.f32.mrb[93].mxu0 }
 0x44f   :  { %v2341_v26 = vadd.f32 %v2340_v25, %v2339_v24  ;;  %v2342_v27 = vpop.f32.mrb[94].mxu0 }
 0x450   :  { %v2343_v29 = vpop.f32.mrb[95].mxu0 }
 0x451   :  { %v1937_v30 = vadd.f32 %v2341_v26, %v3130_v33  ;;  %v2344_v31 = vadd.f32 %v2343_v29, %v2342_v27 }
 0x453   :  { %2021 = vst [vmem:[%s3271_s11 + $0x70] sm:$0xff] %v1937_v30  ;;  %v1940_v32 = vadd.f32 %v2344_v31, %v3130_v33 }
 0x455   :  { %2022 = vst [vmem:[%s3271_s11 + $0x78] sm:$0xff] %v1940_v32  ;;  %v2345_v34 = vpop.f32.mrb[96].mxu0 }
 0x456   :  { %v2346_v56 = vpop.f32.mrb[97].mxu0 }
 0x457   :  { %v2347_v35 = vadd.f32 %v2346_v56, %v2345_v34  ;;  %v2348_v36 = vpop.f32.mrb[98].mxu0 }
 0x458   :  { %v2349_v57 = vpop.f32.mrb[99].mxu0 }
 0x459   :  { %v1945_v37 = vadd.f32 %v2347_v35, %v3130_v33  ;;  %v2350_v38 = vadd.f32 %v2349_v57, %v2348_v36 }
 0x45b   :  { %2023 = vst [vmem:[%s3271_s11 + $0x80] sm:$0xff] %v1945_v37  ;;  %v1948_v39 = vadd.f32 %v2350_v38, %v3130_v33 }
 0x45d   :  { %2024 = vst [vmem:[%s3271_s11 + $0x88] sm:$0xff] %v1948_v39  ;;  %v2351_v40 = vpop.f32.mrb[100].mxu0 }
 0x45e   :  { %v2352_v41 = vpop.f32.mrb[101].mxu0 }
 0x45f   :  { %v2353_v42 = vadd.f32 %v2352_v41, %v2351_v40  ;;  %v2354_v43 = vpop.f32.mrb[102].mxu0 }
 0x460   :  { %v2355_v44 = vpop.f32.mrb[103].mxu0 }
 0x461   :  { %v1953_v45 = vadd.f32 %v2353_v42, %v3130_v33  ;;  %v2356_v46 = vadd.f32 %v2355_v44, %v2354_v43 }
 0x463   :  { %2025 = vst [vmem:[%s3271_s11 + $0x90] sm:$0xff] %v1953_v45  ;;  %v1956_v47 = vadd.f32 %v2356_v46, %v3130_v33 }
 0x465   :  { %2026 = vst [vmem:[%s3271_s11 + $0x98] sm:$0xff] %v1956_v47  ;;  %v2357_v48 = vpop.f32.mrb[104].mxu0 }
 0x466   :  { %v2358_v49 = vpop.f32.mrb[105].mxu0 }
 0x467   :  { %v2359_v50 = vadd.f32 %v2358_v49, %v2357_v48  ;;  %v2360_v51 = vpop.f32.mrb[106].mxu0 }
 0x468   :  { %v2361_v52 = vpop.f32.mrb[107].mxu0 }
 0x469   :  { %v1961_v53 = vadd.f32 %v2359_v50, %v3130_v33  ;;  %v2362_v54 = vadd.f32 %v2361_v52, %v2360_v51 }
 0x46b   :  { %2027 = vst [vmem:[%s3271_s11 + $0xa0] sm:$0xff] %v1961_v53  ;;  %v1964_v55 = vadd.f32 %v2362_v54, %v3130_v33 }
 0x46d   :  { %2028 = vst [vmem:[%s3271_s11 + $0xa8] sm:$0xff] %v1964_v55  ;;  %v2363_v58 = vpop.f32.mrb[108].mxu0 }
 0x46e   :  { %v2364_v1 = vpop.f32.mrb[109].mxu0 }
 0x46f   :  { %v2365_v59 = vadd.f32 %v2364_v1, %v2363_v58  ;;  %v2366_v60 = vpop.f32.mrb[110].mxu0 }
 0x470   :  { %v2367_v61 = vpop.f32.mrb[111].mxu0 }
 0x471   :  { %v1969_v62 = vadd.f32 %v2365_v59, %v3130_v33  ;;  %v2368_v63 = vadd.f32 %v2367_v61, %v2366_v60 }
 0x473   :  { %2029 = vst [vmem:[%s3271_s11 + $0xb0] sm:$0xff] %v1969_v62  ;;  %v1972_v0 = vadd.f32 %v2368_v63, %v3130_v33 }
 0x475   :  { %2030 = vst [vmem:[%s3271_s11 + $0xb8] sm:$0xff] %v1972_v0  ;;  %v2369_v2 = vpop.f32.mrb[112].mxu0 }
 0x476   :  { %v2370_v3 = vpop.f32.mrb[113].mxu0 }
 0x477   :  { %v2371_v4 = vadd.f32 %v2370_v3, %v2369_v2  ;;  %v2372_v5 = vpop.f32.mrb[114].mxu0 }
 0x478   :  { %v2373_v6 = vpop.f32.mrb[115].mxu0 }
 0x479   :  { %v1977_v7 = vadd.f32 %v2371_v4, %v3130_v33  ;;  %v2374_v8 = vadd.f32 %v2373_v6, %v2372_v5 }
 0x47b   :  { %2031 = vst [vmem:[%s3271_s11 + $0xc0] sm:$0xff] %v1977_v7  ;;  %v1980_v9 = vadd.f32 %v2374_v8, %v3130_v33 }
 0x47d   :  { %2032 = vst [vmem:[%s3271_s11 + $0xc8] sm:$0xff] %v1980_v9  ;;  %v2375_v10 = vpop.f32.mrb[116].mxu0 }
 0x47e   :  { %v2376_v11 = vpop.f32.mrb[117].mxu0 }
 0x47f   :  { %v2377_v12 = vadd.f32 %v2376_v11, %v2375_v10  ;;  %v2378_v13 = vpop.f32.mrb[118].mxu0 }
 0x480   :  { %v2379_v14 = vpop.f32.mrb[119].mxu0 }
 0x481   :  { %v1985_v15 = vadd.f32 %v2377_v12, %v3130_v33  ;;  %v2380_v16 = vadd.f32 %v2379_v14, %v2378_v13 }
 0x483   :  { %2033 = vst [vmem:[%s3271_s11 + $0xd0] sm:$0xff] %v1985_v15  ;;  %v1988_v17 = vadd.f32 %v2380_v16, %v3130_v33 }
 0x485   :  { %2034 = vst [vmem:[%s3271_s11 + $0xd8] sm:$0xff] %v1988_v17  ;;  %v2381_v18 = vpop.f32.mrb[120].mxu0 }
 0x486   :  { %v2382_v19 = vpop.f32.mrb[121].mxu0 }
 0x487   :  { %v2383_v20 = vadd.f32 %v2382_v19, %v2381_v18  ;;  %v2384_v21 = vpop.f32.mrb[122].mxu0 }
 0x488   :  { %v2385_v22 = vpop.f32.mrb[123].mxu0 }
 0x489   :  { %v1993_v23 = vadd.f32 %v2383_v20, %v3130_v33  ;;  %v2386_v28 = vadd.f32 %v2385_v22, %v2384_v21 }
 0x48b   :  { %2035 = vst [vmem:[%s3271_s11 + $0xe0] sm:$0xff] %v1993_v23  ;;  %v1996_v24 = vadd.f32 %v2386_v28, %v3130_v33 }
 0x48d   :  { %2036 = vst [vmem:[%s3271_s11 + $0xe8] sm:$0xff] %v1996_v24  ;;  %v2387_v25 = vpop.f32.mrb[124].mxu0 }
 0x48e   :  { %v2388_v26 = vpop.f32.mrb[125].mxu0 }
 0x48f   :  { %v2389_v27 = vadd.f32 %v2388_v26, %v2387_v25  ;;  %v2390_v29 = vpop.f32.mrb[126].mxu0 }
 0x490   :  { %v2391_v30 = vpop.f32.mrb[127].mxu0 }
 0x491   :  { %v2001_v31 = vadd.f32 %v2389_v27, %v3130_v33  ;;  %v2392_v32 = vadd.f32 %v2391_v30, %v2390_v29 }
 0x493   :  { %2037 = vst [vmem:[%s3271_s11 + $0xf0] sm:$0xff] %v2001_v31  ;;  %v2004_v34 = vadd.f32 %v2392_v32, %v3130_v33 }
 0x495   :  { %2038 = vst [vmem:[%s3271_s11 + $0xf8] sm:$0xff] %v2004_v34 }

</bundles_post_ra>
